<compile_context>
chip_gen: v5e
topology: v5e:2x2
jax: 0.10.0
libtpu: 0.0.40
codegen_flags: <defaults>
</compile_context>

<pallas_src>
import jax
import jax.numpy as jnp
from jax.experimental import pallas as pl
from jax.experimental.pallas import tpu as pltpu

HIDDEN = 500
HIDDEN_PAD = 512  # multiple of 128 (lane) and 8 (sublane)


def _round_up(n, m):
    return ((n + m - 1) // m) * m


def _mlp_kernel(x_ref, w1_ref, b1_ref, w2_ref, b2_ref, o_ref):
    # x_ref : (1, TB)        batch on lanes
    # w1_ref: (HIDDEN_PAD,1) first-layer weight column  (l1.weight[:, 0])
    # b1_ref: (HIDDEN_PAD,1) first-layer bias column
    # w2_ref: (HIDDEN_PAD,1) second-layer weight column (l2.weight[0, :])
    # b2_ref: (1, 1)         second-layer bias
    x = x_ref[...]                                            # (1, TB)
    # Layer 1: VPU broadcast outer product + bias + ReLU -> (HIDDEN_PAD, TB)
    h = jnp.maximum(w1_ref[...] * x + b1_ref[...], 0.0)
    # Layer 2: VPU multiply, XLU sublane-reduce over hidden, bias, ReLU -> (1, TB)
    y = jnp.sum(h * w2_ref[...], axis=0, keepdims=True) + b2_ref[...]
    o_ref[...] = jnp.maximum(y, 0.0)


def prepare_params(w1, b1, w2, b2):
    """Pad/transpose PyTorch-shaped params once (call at init, not per step).

    w1: (500, 1)  b1: (500,)  w2: (1, 500)  b2: (1,)
    """
    pad = HIDDEN_PAD - HIDDEN
    w1c = jnp.pad(w1.astype(jnp.float32), ((0, pad), (0, 0)))                  # (512, 1)
    b1c = jnp.pad(b1.astype(jnp.float32), (0, pad)).reshape(HIDDEN_PAD, 1)     # (512, 1)
    w2c = jnp.pad(w2.astype(jnp.float32), ((0, 0), (0, pad))).reshape(HIDDEN_PAD, 1)  # (512, 1)
    b2c = b2.astype(jnp.float32).reshape(1, 1)                                 # (1, 1)
    return w1c, b1c, w2c, b2c


def one_layer_net_forward(x, params, *, batch_tile=512):
    """x: (B, 1) f32; params: output of prepare_params. Returns (B, 1) f32."""
    w1c, b1c, w2c, b2c = params
    B = x.shape[0]

    # Batch on lanes (last dim of x is 1, so reshape == transpose).
    x_row = x.astype(jnp.float32).reshape(1, B)

    # Lane-aligned batch tile; pad batch with zeros (sliced off afterwards).
    tb = min(batch_tile, _round_up(B, 128))
    b_pad = _round_up(B, tb)
    if b_pad != B:
        x_row = jnp.pad(x_row, ((0, 0), (0, b_pad - B)))
    grid = (b_pad // tb,)

    cost = pl.CostEstimate(
        flops=4 * b_pad * HIDDEN_PAD,          # 2 mul + 2 add per (hidden, batch)
        transcendentals=0,
        bytes_accessed=4 * (2 * b_pad + 3 * HIDDEN_PAD + 1),
    )

    out = pl.pallas_call(
        _mlp_kernel,
        out_shape=jax.ShapeDtypeStruct((1, b_pad), jnp.float32),
        grid_spec=pl.GridSpec(
            grid=grid,
            in_specs=[
                pl.BlockSpec((1, tb), lambda i: (0, i)),            # x tile (pipelined)
                pl.BlockSpec((HIDDEN_PAD, 1), lambda i: (0, 0)),    # w1 (VMEM-resident)
                pl.BlockSpec((HIDDEN_PAD, 1), lambda i: (0, 0)),    # b1
                pl.BlockSpec((HIDDEN_PAD, 1), lambda i: (0, 0)),    # w2
                pl.BlockSpec((1, 1), lambda i: (0, 0)),             # b2
            ],
            out_specs=pl.BlockSpec((1, tb), lambda i: (0, i)),      # lane-dense output
        ),
        compiler_params=pltpu.CompilerParams(
            dimension_semantics=("parallel",)),
        cost_estimate=cost,
    )(x_row, w1c, b1c, w2c, b2c)

    return out[:, :B].reshape(B, 1)


def init_params(key):
    """Deterministic params matching the PyTorch module's shapes / init style."""
    k1, k2, k3, k4 = jax.random.split(key, 4)
    # xavier_uniform: U(-a, a), a = sqrt(6 / (fan_in + fan_out))
    a1 = (6.0 / (1 + HIDDEN)) ** 0.5
    w1 = jax.random.uniform(k1, (HIDDEN, 1), jnp.float32, -a1, a1)
    a2 = (6.0 / (HIDDEN + 1)) ** 0.5
    w2 = jax.random.uniform(k2, (1, HIDDEN), jnp.float32, -a2, a2)
    # nn.Linear default bias init: U(-1/sqrt(fan_in), 1/sqrt(fan_in))
    b1 = jax.random.uniform(k3, (HIDDEN,), jnp.float32, -1.0, 1.0)   # fan_in = 1
    bb = 1.0 / (HIDDEN ** 0.5)
    b2 = jax.random.uniform(k4, (1,), jnp.float32, -bb, bb)
    return w1, b1, w2, b2


if __name__ == "__main__":
    key = jax.random.PRNGKey(0)
    kx, kp = jax.random.split(key)
    B = 8
    x = jax.random.uniform(kx, (B, 1), jnp.float32, -1.0, 1.0)
    w1, b1, w2, b2 = init_params(kp)

    params = prepare_params(w1, b1, w2, b2)   # pad/transpose once at init
    out = one_layer_net_forward(x, params)
    out = jax.block_until_ready(out)

    # Pure-JAX reference check (PyTorch convention: x @ W^T + b).
    h_ref = jnp.maximum(x @ w1.T + b1, 0.0)
    y_ref = jnp.maximum(h_ref @ w2.T + b2, 0.0)
    assert out.shape == (B, 1)
    assert jnp.allclose(out, y_ref, atol=1e-4, rtol=1e-4)

    print("KERNEL_OK")
</pallas_src>

<mosaic_0001>
module attributes {stable_mosaic.version = 11 : i64} {
  func.func @_mlp_kernel(%arg0: i32, %arg1: memref<1x128xf32, #tpu.memory_space<vmem>>, %arg2: memref<512x1xf32, #tpu.memory_space<vmem>>, %arg3: memref<512x1xf32, #tpu.memory_space<vmem>>, %arg4: memref<512x1xf32, #tpu.memory_space<vmem>>, %arg5: memref<1x1xf32, #tpu.memory_space<vmem>>, %arg6: memref<1x128xf32, #tpu.memory_space<vmem>>) attributes {dimension_semantics = [#tpu.dimension_semantics<parallel>], iteration_bounds = array<i64: 1>, scalar_prefetch = 0 : i64, scratch_operands = 0 : i64, tpu.core_type = #tpu.core_type<tc>, window_params = [{transform_indices = @transform_0, window_bounds = array<i64: 1, 128>}, {pipeline_mode = #tpu.pipeline_mode<synchronous>, transform_indices = @transform_1, window_bounds = array<i64: 512, 1>}, {pipeline_mode = #tpu.pipeline_mode<synchronous>, transform_indices = @transform_2, window_bounds = array<i64: 512, 1>}, {pipeline_mode = #tpu.pipeline_mode<synchronous>, transform_indices = @transform_3, window_bounds = array<i64: 512, 1>}, {pipeline_mode = #tpu.pipeline_mode<synchronous>, transform_indices = @transform_4, window_bounds = array<i64: 1, 1>}, {transform_indices = @transform_5, window_bounds = array<i64: 1, 128>}]} {
    %c0 = arith.constant 0 : index
    %c0_0 = arith.constant 0 : index
    %0 = vector.load %arg1[%c0, %c0_0] : memref<1x128xf32, #tpu.memory_space<vmem>>, vector<1x128xf32>
    %c0_1 = arith.constant 0 : index
    %c0_2 = arith.constant 0 : index
    %1 = vector.load %arg2[%c0_1, %c0_2] : memref<512x1xf32, #tpu.memory_space<vmem>>, vector<512x1xf32>
    %2 = vector.broadcast %1 : vector<512x1xf32> to vector<512x128xf32>
    %3 = vector.broadcast %0 : vector<1x128xf32> to vector<512x128xf32>
    %4 = arith.mulf %2, %3 : vector<512x128xf32>
    %c0_3 = arith.constant 0 : index
    %c0_4 = arith.constant 0 : index
    %5 = vector.load %arg3[%c0_3, %c0_4] : memref<512x1xf32, #tpu.memory_space<vmem>>, vector<512x1xf32>
    %6 = vector.broadcast %5 : vector<512x1xf32> to vector<512x128xf32>
    %7 = arith.addf %4, %6 : vector<512x128xf32>
    %cst = arith.constant 0.000000e+00 : f32
    %8 = vector.broadcast %cst : f32 to vector<512x128xf32>
    %9 = arith.maximumf %7, %8 : vector<512x128xf32>
    %c0_5 = arith.constant 0 : index
    %c0_6 = arith.constant 0 : index
    %10 = vector.load %arg4[%c0_5, %c0_6] : memref<512x1xf32, #tpu.memory_space<vmem>>, vector<512x1xf32>
    %11 = vector.broadcast %10 : vector<512x1xf32> to vector<512x128xf32>
    %12 = arith.mulf %9, %11 : vector<512x128xf32>
    %cst_7 = arith.constant dense<0.000000e+00> : vector<128xf32>
    %13 = vector.multi_reduction <add>, %12, %cst_7 [0] : vector<512x128xf32> to vector<128xf32>
    %14 = vector.shape_cast %13 : vector<128xf32> to vector<1x128xf32>
    %c0_8 = arith.constant 0 : index
    %c0_9 = arith.constant 0 : index
    %15 = vector.load %arg5[%c0_8, %c0_9] : memref<1x1xf32, #tpu.memory_space<vmem>>, vector<1x1xf32>
    %16 = vector.broadcast %15 : vector<1x1xf32> to vector<1x128xf32>
    %17 = arith.addf %14, %16 : vector<1x128xf32>
    %cst_10 = arith.constant 0.000000e+00 : f32
    %18 = vector.broadcast %cst_10 : f32 to vector<1x128xf32>
    %19 = arith.maximumf %17, %18 : vector<1x128xf32>
    %c0_11 = arith.constant 0 : index
    %c0_12 = arith.constant 0 : index
    %20 = vector.load %arg6[%c0_11, %c0_12] : memref<1x128xf32, #tpu.memory_space<vmem>>, vector<1x128xf32>
    tpu.vector_store %arg6[%c0_11, %c0_12], %19 {strides = array<i32>} : memref<1x128xf32, #tpu.memory_space<vmem>>, vector<1x128xf32>,
    return
  }
  func.func @transform_0(%arg0: i32) -> (i32, i32) {
    %c0_i32 = arith.constant 0 : i32
    %c0_i32_0 = arith.constant 0 : i32
    return %c0_i32, %arg0 : i32, i32
  }
  func.func @transform_1(%arg0: i32) -> (i32, i32) {
    %c0_i32 = arith.constant 0 : i32
    %c0_i32_0 = arith.constant 0 : i32
    %c0_i32_1 = arith.constant 0 : i32
    return %c0_i32, %c0_i32_0 : i32, i32
  }
  func.func @transform_2(%arg0: i32) -> (i32, i32) {
    %c0_i32 = arith.constant 0 : i32
    %c0_i32_0 = arith.constant 0 : i32
    %c0_i32_1 = arith.constant 0 : i32
    return %c0_i32, %c0_i32_0 : i32, i32
  }
  func.func @transform_3(%arg0: i32) -> (i32, i32) {
    %c0_i32 = arith.constant 0 : i32
    %c0_i32_0 = arith.constant 0 : i32
    %c0_i32_1 = arith.constant 0 : i32
    return %c0_i32, %c0_i32_0 : i32, i32
  }
  func.func @transform_4(%arg0: i32) -> (i32, i32) {
    %c0_i32 = arith.constant 0 : i32
    %c0_i32_0 = arith.constant 0 : i32
    %c0_i32_1 = arith.constant 0 : i32
    return %c0_i32, %c0_i32_0 : i32, i32
  }
  func.func @transform_5(%arg0: i32) -> (i32, i32) {
    %c0_i32 = arith.constant 0 : i32
    %c0_i32_0 = arith.constant 0 : i32
    return %c0_i32, %arg0 : i32, i32
  }
}

</mosaic_0001>

<bundles_post_ra>
// kernel: tpu_custom_call.1
= control target key start
LH: loop header
LB: loop body
LE: loop exit
PB: predicated region body
PF: predicated region fallthrough
CT: control target
= control target key end

     0   :  { %s2659_s0 = inlined_call_operand.vmem [shape: f32[1,128], index: 0, kind: input, shape index: {}]   ;;  %s2660_s1 = inlined_call_operand.vmem [shape: f32[512,1], index: 1, kind: input, shape index: {}]   ;;  %s2661_s2 = inlined_call_operand.vmem [shape: f32[512,1], index: 2, kind: input, shape index: {}]   ;;  %s2662_s3 = inlined_call_operand.vmem [shape: f32[512,1], index: 3, kind: input, shape index: {}]   ;;  %s2663_s4 = inlined_call_operand.<no memory space> [shape: f32[1,1], index: 4, kind: input, shape index: {}]   ;;  %s2664_s5 = inlined_call_operand.hbm [shape: f32[1,128], index: 5, kind: output, shape index: {}]  }
   0x1   :  { %v10_v0 = vstv %s2663_s4 }
   0x2   :  { %11 = vst [vmem:[#allocation2] sm:$0x1] %v10_v0 }
   0x3   :  { %v28_v1 = vld [vmem:[%s2660_s1 + $0x20] sm:$0xff]  ;;  %v26_v2 = vld [vmem:[%s2660_s1 + $0x10] sm:$0xff]  ;;  %v1562_v4 = vmov 0  }
   0x4   :  { %v24_v3 = vld [vmem:[%s2660_s1] sm:$0xff]  ;;  %1534 = vset.pattern.permute.xlu2 %v1562_v4  ;;  %1533 = vset.pattern.permute.xlu1 %v1562_v4 }
   0x5   :  { %1532 = vset.pattern.permute.xlu0 %v1562_v4  ;;  %110 = vperm.xlu2 %1534, %v28_v1  }
   0x6   :  { %100 = vperm.xlu1 %1533, %v26_v2   ;;  %90 = vperm.xlu0 %1532, %v24_v3  }
   0x7   :  { %12 = vsyncpa [#allocation4], 0  ;;  %v29_v5 = vld [vmem:[%s2660_s1 + $0x28] sm:$0xff]  ;;  %v27_v6 = vld [vmem:[%s2660_s1 + $0x18] sm:$0xff]  ;;  %s1521_s26 = sshll.u32 %s2664_s5, 4  ;;  %s1522_s26 = int_to_ptr.hbm [resolvable:$true] %s1521_s26 }
   0x8   :  { %v25_v7 = vld [vmem:[%s2660_s1 + $0x8] sm:$0xff]  ;;  %v32_v8 = vld [vmem:[%s2660_s1 + $0x40] sm:$0xff]  ;;  %v31_v9 = vld [vmem:[%s2660_s1 + $0x38] sm:$0xff] }
   0x9   :  { %v30_v10 = vld [vmem:[%s2660_s1 + $0x30] sm:$0xff]  ;;  %v35_v11 = vld [vmem:[%s2660_s1 + $0x58] sm:$0xff]  ;;  %v33_v13 = vld [vmem:[%s2660_s1 + $0x48] sm:$0xff] }
   0xa   :  { %v34_v12 = vld [vmem:[%s2660_s1 + $0x50] sm:$0xff]  ;;  %v37_v15 = vld [vmem:[%s2660_s1 + $0x68] sm:$0xff]  ;;  %v36_v16 = vld [vmem:[%s2660_s1 + $0x60] sm:$0xff] }
   0xb   :  { %v38_v14 = vld [vmem:[%s2660_s1 + $0x70] sm:$0xff]  ;;  %v41_v17 = vld [vmem:[%s2660_s1 + $0x88] sm:$0xff]  ;;  %v40_v18 = vld [vmem:[%s2660_s1 + $0x80] sm:$0xff] }
   0xc   :  { %v39_v19 = vld [vmem:[%s2660_s1 + $0x78] sm:$0xff]  ;;  %v44_v20 = vld [vmem:[%s2660_s1 + $0xa0] sm:$0xff]  ;;  %v42_v22 = vld [vmem:[%s2660_s1 + $0x90] sm:$0xff] }
   0xd   :  { %115 = vperm.xlu2 %1534, %v29_v5   ;;  %v43_v21 = vld [vmem:[%s2660_s1 + $0x98] sm:$0xff]  ;;  %v46_v24 = vld [vmem:[%s2660_s1 + $0xb0] sm:$0xff]  ;;  %v45_v25 = vld [vmem:[%s2660_s1 + $0xa8] sm:$0xff] }
   0xe   :  { %105 = vperm.xlu1 %1533, %v27_v6   ;;  %95 = vperm.xlu0 %1532, %v25_v7   ;;  %v47_v23 = vld [vmem:[%s2660_s1 + $0xb8] sm:$0xff]  ;;  %v50_v26 = vld [vmem:[%s2660_s1 + $0xd0] sm:$0xff]  ;;  %v49_v27 = vld [vmem:[%s2660_s1 + $0xc8] sm:$0xff] }
   0xf   :  { %v48_v28 = vld [vmem:[%s2660_s1 + $0xc0] sm:$0xff]  ;;  %v53_v29 = vld [vmem:[%s2660_s1 + $0xe8] sm:$0xff]  ;;  %v51_v31 = vld [vmem:[%s2660_s1 + $0xd8] sm:$0xff] }
  0x10   :  { %v52_v30 = vld [vmem:[%s2660_s1 + $0xe0] sm:$0xff]  ;;  %v55_v33 = vld [vmem:[%s2660_s1 + $0xf8] sm:$0xff]  ;;  %v54_v34 = vld [vmem:[%s2660_s1 + $0xf0] sm:$0xff] }
  0x11   :  { %v56_v32 = vld [vmem:[%s2660_s1 + $0x100] sm:$0xff]  ;;  %v59_v35 = vld [vmem:[%s2660_s1 + $0x118] sm:$0xff]  ;;  %v58_v36 = vld [vmem:[%s2660_s1 + $0x110] sm:$0xff] }
  0x12   :  { %v57_v37 = vld [vmem:[%s2660_s1 + $0x108] sm:$0xff]  ;;  %v62_v39 = vld [vmem:[%s2660_s1 + $0x130] sm:$0xff]  ;;  %v60_v41 = vld [vmem:[%s2660_s1 + $0x120] sm:$0xff] }
  0x13   :  { %v61_v40 = vld [vmem:[%s2660_s1 + $0x128] sm:$0xff]  ;;  %v64_v44 = vld [vmem:[%s2660_s1 + $0x140] sm:$0xff]  ;;  %v63_v45 = vld [vmem:[%s2660_s1 + $0x138] sm:$0xff] }
  0x14   :  { %v65_v43 = vld [vmem:[%s2660_s1 + $0x148] sm:$0xff]  ;;  %v68_v47 = vld [vmem:[%s2660_s1 + $0x160] sm:$0xff]  ;;  %v67_v48 = vld [vmem:[%s2660_s1 + $0x158] sm:$0xff] }
  0x15   :  { %130 = vperm.xlu2 %1534, %v32_v8   ;;  %v66_v49 = vld [vmem:[%s2660_s1 + $0x150] sm:$0xff]  ;;  %v71_v53 = vld [vmem:[%s2660_s1 + $0x178] sm:$0xff]  ;;  %v69_v55 = vld [vmem:[%s2660_s1 + $0x168] sm:$0xff] }
  0x16   :  { %125 = vperm.xlu1 %1533, %v31_v9   ;;  %120 = vperm.xlu0 %1532, %v30_v10   ;;  %v70_v54 = vld [vmem:[%s2660_s1 + $0x170] sm:$0xff]  ;;  %v73_v60 = vld [vmem:[%s2660_s1 + $0x188] sm:$0xff]  ;;  %v72_v61 = vld [vmem:[%s2660_s1 + $0x180] sm:$0xff] }
  0x17   :  { %v74_v59 = vld [vmem:[%s2660_s1 + $0x190] sm:$0xff]  ;;  %v77_v1 = vld [vmem:[%s2660_s1 + $0x1a8] sm:$0xff]  ;;  %v76_v2 = vld [vmem:[%s2660_s1 + $0x1a0] sm:$0xff] }
  0x18   :  { %v75_v3 = vld [vmem:[%s2660_s1 + $0x198] sm:$0xff]  ;;  %v80_v7 = vld [vmem:[%s2660_s1 + $0x1c0] sm:$0xff]  ;;  %v78_v9 = vld [vmem:[%s2660_s1 + $0x1b0] sm:$0xff] }
  0x19   :  { %v79_v8 = vld [vmem:[%s2660_s1 + $0x1b8] sm:$0xff] }
  0x1d   :  { %145 = vperm.xlu2 %1534, %v35_v11  }
  0x1e   :  { %140 = vperm.xlu1 %1533, %v34_v12   ;;  %135 = vperm.xlu0 %1532, %v33_v13   ;;  %v83_v13 = vld [vmem:[%s2660_s1 + $0x1d8] sm:$0xff] }
  0x25   :  { %160 = vperm.xlu2 %1534, %v38_v14   ;;  %v82_v14 = vld [vmem:[%s2660_s1 + $0x1d0] sm:$0xff] }
  0x26   :  { %155 = vperm.xlu1 %1533, %v37_v15   ;;  %150 = vperm.xlu0 %1532, %v36_v16   ;;  %v81_v15 = vld [vmem:[%s2660_s1 + $0x1c8] sm:$0xff] }
  0x2d   :  { %175 = vperm.xlu2 %1534, %v41_v17  }
  0x2e   :  { %170 = vperm.xlu1 %1533, %v40_v18   ;;  %165 = vperm.xlu0 %1532, %v39_v19   ;;  %v86_v19 = vld [vmem:[%s2660_s1 + $0x1f0] sm:$0xff] }
  0x35   :  { %190 = vperm.xlu2 %1534, %v44_v20   ;;  %v85_v20 = vld [vmem:[%s2660_s1 + $0x1e8] sm:$0xff] }
  0x36   :  { %185 = vperm.xlu1 %1533, %v43_v21   ;;  %180 = vperm.xlu0 %1532, %v42_v22   ;;  %v84_v21 = vld [vmem:[%s2660_s1 + $0x1e0] sm:$0xff] }
  0x3d   :  { %205 = vperm.xlu2 %1534, %v47_v23  }
  0x3e   :  { %200 = vperm.xlu1 %1533, %v46_v24   ;;  %195 = vperm.xlu0 %1532, %v45_v25   ;;  %v476_v25 = vld [vmem:[%s2661_s2 + $0x8] sm:$0xff] }
  0x45   :  { %220 = vperm.xlu2 %1534, %v50_v26   ;;  %v475_v26 = vld [vmem:[%s2661_s2] sm:$0xff] }
  0x46   :  { %215 = vperm.xlu1 %1533, %v49_v27   ;;  %210 = vperm.xlu0 %1532, %v48_v28   ;;  %v87_v27 = vld [vmem:[%s2660_s1 + $0x1f8] sm:$0xff] }
  0x4d   :  { %235 = vperm.xlu2 %1534, %v53_v29  }
  0x4e   :  { %230 = vperm.xlu1 %1533, %v52_v30   ;;  %225 = vperm.xlu0 %1532, %v51_v31   ;;  %v479_v31 = vld [vmem:[%s2661_s2 + $0x20] sm:$0xff] }
  0x55   :  { %250 = vperm.xlu2 %1534, %v56_v32   ;;  %v478_v32 = vld [vmem:[%s2661_s2 + $0x18] sm:$0xff] }
  0x56   :  { %245 = vperm.xlu1 %1533, %v55_v33   ;;  %240 = vperm.xlu0 %1532, %v54_v34   ;;  %v477_v33 = vld [vmem:[%s2661_s2 + $0x10] sm:$0xff] }
  0x5d   :  { %265 = vperm.xlu2 %1534, %v59_v35  }
  0x5e   :  { %260 = vperm.xlu1 %1533, %v58_v36   ;;  %255 = vperm.xlu0 %1532, %v57_v37   ;;  %v482_v37 = vld [vmem:[%s2661_s2 + $0x38] sm:$0xff] }
  0x5f   :  { %v1705_v38 = vpop.permute.xlu2 %110 }
  0x65   :  { %280 = vperm.xlu2 %1534, %v62_v39   ;;  %v481_v39 = vld [vmem:[%s2661_s2 + $0x30] sm:$0xff] }
  0x66   :  { %275 = vperm.xlu1 %1533, %v61_v40   ;;  %270 = vperm.xlu0 %1532, %v60_v41   ;;  %v480_v40 = vld [vmem:[%s2661_s2 + $0x28] sm:$0xff] }
  0x67   :  { %v1716_v42 = vpop.permute.xlu2 %115 }
  0x6d   :  { %295 = vperm.xlu2 %1534, %v65_v43  }
  0x6e   :  { %290 = vperm.xlu1 %1533, %v64_v44   ;;  %285 = vperm.xlu0 %1532, %v63_v45   ;;  %v485_v45 = vld [vmem:[%s2661_s2 + $0x50] sm:$0xff] }
  0x6f   :  { %v1727_v46 = vpop.permute.xlu2 %130 }
  0x75   :  { %310 = vperm.xlu2 %1534, %v68_v47   ;;  %v484_v47 = vld [vmem:[%s2661_s2 + $0x48] sm:$0xff] }
  0x76   :  { %305 = vperm.xlu1 %1533, %v67_v48   ;;  %300 = vperm.xlu0 %1532, %v66_v49   ;;  %v483_v48 = vld [vmem:[%s2661_s2 + $0x40] sm:$0xff] }
  0x77   :  { %v1738_v50 = vpop.permute.xlu2 %145 }
  0x78   :  { %v1740_v51 = vpop.permute.xlu1 %100  ;;  %v1742_v52 = vpop.permute.xlu0 %90 }
  0x7d   :  { %325 = vperm.xlu2 %1534, %v71_v53  }
  0x7e   :  { %320 = vperm.xlu1 %1533, %v70_v54   ;;  %315 = vperm.xlu0 %1532, %v69_v55   ;;  %v488_v55 = vld [vmem:[%s2661_s2 + $0x68] sm:$0xff] }
  0x7f   :  { %v1753_v56 = vpop.permute.xlu2 %160 }
  0x80   :  { %v1755_v57 = vpop.permute.xlu1 %105  ;;  %v1757_v58 = vpop.permute.xlu0 %95 }
  0x85   :  { %340 = vperm.xlu2 %1534, %v74_v59   ;;  %v487_v59 = vld [vmem:[%s2661_s2 + $0x60] sm:$0xff] }
  0x86   :  { %335 = vperm.xlu1 %1533, %v73_v60   ;;  %330 = vperm.xlu0 %1532, %v72_v61   ;;  %v486_v60 = vld [vmem:[%s2661_s2 + $0x58] sm:$0xff] }
  0x87   :  { %v1768_v62 = vpop.permute.xlu2 %175 }
  0x88   :  { %v1770_v63 = vpop.permute.xlu1 %125  ;;  %v1772_v0 = vpop.permute.xlu0 %120 }
  0x8d   :  { %355 = vperm.xlu2 %1534, %v77_v1  }
  0x8e   :  { %350 = vperm.xlu1 %1533, %v76_v2   ;;  %345 = vperm.xlu0 %1532, %v75_v3   ;;  %v491_v3 = vld [vmem:[%s2661_s2 + $0x80] sm:$0xff] }
  0x8f   :  { %v1783_v4 = vpop.permute.xlu2 %190 }
  0x90   :  { %2665 = vst [vmem:[#allocation6_spill] sm:$0xff] %v1783_v4  ;;  %v1785_v5 = vpop.permute.xlu1 %140  ;;  %v1787_v6 = vpop.permute.xlu0 %135  ;;  %v990_v4 = vld [vmem:[%s2662_s3 + $0x18] sm:$0xff] }
  0x95   :  { %370 = vperm.xlu2 %1534, %v80_v7   ;;  %v490_v7 = vld [vmem:[%s2661_s2 + $0x78] sm:$0xff] }
  0x96   :  { %365 = vperm.xlu1 %1533, %v79_v8   ;;  %360 = vperm.xlu0 %1532, %v78_v9   ;;  %v489_v8 = vld [vmem:[%s2661_s2 + $0x70] sm:$0xff] }
  0x97   :  { %v1798_v10 = vpop.permute.xlu2 %205 }
  0x98   :  { %2666 = vst [vmem:[#allocation7_spill] sm:$0xff] %v1798_v10  ;;  %v1800_v11 = vpop.permute.xlu1 %155  ;;  %v1802_v12 = vpop.permute.xlu0 %150  ;;  %v536_v10 = vld [vmem:[%s2661_s2 + $0x1e8] sm:$0xff] }
  0x9d   :  { %385 = vperm.xlu2 %1534, %v83_v13  }
  0x9e   :  { %380 = vperm.xlu1 %1533, %v82_v14   ;;  %375 = vperm.xlu0 %1532, %v81_v15   ;;  %v494_v15 = vld [vmem:[%s2661_s2 + $0x98] sm:$0xff] }
  0x9f   :  { %v1813_v16 = vpop.permute.xlu2 %220 }
  0xa0   :  { %2667 = vst [vmem:[#allocation8_spill] sm:$0xff] %v1813_v16  ;;  %v1815_v17 = vpop.permute.xlu1 %170  ;;  %v1817_v18 = vpop.permute.xlu0 %165 }
  0xa5   :  { %400 = vperm.xlu2 %1534, %v86_v19   ;;  %v493_v19 = vld [vmem:[%s2661_s2 + $0x90] sm:$0xff] }
  0xa6   :  { %395 = vperm.xlu1 %1533, %v85_v20   ;;  %390 = vperm.xlu0 %1532, %v84_v21   ;;  %v492_v20 = vld [vmem:[%s2661_s2 + $0x88] sm:$0xff] }
  0xa7   :  { %v1828_v22 = vpop.permute.xlu2 %235 }
  0xa8   :  { %2668 = vst [vmem:[#allocation9_spill] sm:$0xff] %v1828_v22  ;;  %v1830_v23 = vpop.permute.xlu1 %185  ;;  %v1832_v24 = vpop.permute.xlu0 %180 }
  0xa9   :  { %2669 = vst [vmem:[#allocation10_spill] sm:$0xff] %v1830_v23  ;;  %v989_v23 = vld [vmem:[%s2662_s3 + $0x10] sm:$0xff] }
  0xad   :  { %546 = vperm.xlu2 %1534, %v476_v25  }
  0xae   :  { %541 = vperm.xlu1 %1533, %v475_v26   ;;  %405 = vperm.xlu0 %1532, %v87_v27   ;;  %v497_v27 = vld [vmem:[%s2661_s2 + $0xb0] sm:$0xff] }
  0xaf   :  { %v1843_v28 = vpop.permute.xlu2 %250 }
  0xb0   :  { %2670 = vst [vmem:[#allocation11_spill] sm:$0xff] %v1843_v28  ;;  %v1845_v29 = vpop.permute.xlu1 %200  ;;  %v1847_v30 = vpop.permute.xlu0 %195 }
  0xb1   :  { %2671 = vst [vmem:[#allocation12_spill] sm:$0xff] %v1845_v29  ;;  %v535_v29 = vld [vmem:[%s2661_s2 + $0x1e0] sm:$0xff] }
  0xb2   :  { %2672 = vst [vmem:[#allocation13_spill] sm:$0xff] %v1847_v30  ;;  %v987_v30 = vld [vmem:[%s2662_s3] sm:$0xff] }
  0xb5   :  { %561 = vperm.xlu2 %1534, %v479_v31   ;;  %v496_v31 = vld [vmem:[%s2661_s2 + $0xa8] sm:$0xff] }
  0xb6   :  { %556 = vperm.xlu1 %1533, %v478_v32   ;;  %551 = vperm.xlu0 %1532, %v477_v33   ;;  %v495_v32 = vld [vmem:[%s2661_s2 + $0xa0] sm:$0xff] }
  0xb7   :  { %v1858_v34 = vpop.permute.xlu2 %265 }
  0xb8   :  { %2673 = vst [vmem:[#allocation14_spill] sm:$0xff] %v1858_v34  ;;  %v1860_v35 = vpop.permute.xlu1 %215  ;;  %v1862_v36 = vpop.permute.xlu0 %210 }
  0xb9   :  { %2674 = vst [vmem:[#allocation15_spill] sm:$0xff] %v1860_v35  ;;  %v533_v35 = vld [vmem:[%s2661_s2 + $0x1d0] sm:$0xff] }
  0xba   :  { %2675 = vst [vmem:[#allocation16_spill] sm:$0xff] %v1862_v36  ;;  %v532_v36 = vld [vmem:[%s2661_s2 + $0x1c8] sm:$0xff] }
  0xbd   :  { %576 = vperm.xlu2 %1534, %v482_v37  }
  0xbe   :  { %571 = vperm.xlu1 %1533, %v481_v39   ;;  %566 = vperm.xlu0 %1532, %v480_v40   ;;  %v500_v40 = vld [vmem:[%s2661_s2 + $0xc8] sm:$0xff] }
  0xbf   :  { %v1873_v41 = vpop.permute.xlu2 %280 }
  0xc0   :  { %2676 = vst [vmem:[#allocation17_spill] sm:$0xff] %v1873_v41  ;;  %v1875_v43 = vpop.permute.xlu1 %230  ;;  %v1877_v44 = vpop.permute.xlu0 %225 }
  0xc1   :  { %2677 = vst [vmem:[#allocation18_spill] sm:$0xff] %v1875_v43  ;;  %v530_v43 = vld [vmem:[%s2661_s2 + $0x1b8] sm:$0xff] }
  0xc2   :  { %2678 = vst [vmem:[#allocation19_spill] sm:$0xff] %v1877_v44  ;;  %v529_v44 = vld [vmem:[%s2661_s2 + $0x1b0] sm:$0xff] }
  0xc5   :  { %591 = vperm.xlu2 %1534, %v485_v45   ;;  %v499_v45 = vld [vmem:[%s2661_s2 + $0xc0] sm:$0xff] }
  0xc6   :  { %586 = vperm.xlu1 %1533, %v484_v47   ;;  %581 = vperm.xlu0 %1532, %v483_v48   ;;  %v498_v47 = vld [vmem:[%s2661_s2 + $0xb8] sm:$0xff] }
  0xc7   :  { %v1888_v49 = vpop.permute.xlu2 %295 }
  0xc8   :  { %2679 = vst [vmem:[#allocation20_spill] sm:$0xff] %v1888_v49  ;;  %v1890_v53 = vpop.permute.xlu1 %245  ;;  %v1892_v54 = vpop.permute.xlu0 %240 }
  0xc9   :  { %2680 = vst [vmem:[#allocation21_spill] sm:$0xff] %v1890_v53  ;;  %v527_v53 = vld [vmem:[%s2661_s2 + $0x1a0] sm:$0xff] }
  0xca   :  { %2681 = vst [vmem:[#allocation22_spill] sm:$0xff] %v1892_v54  ;;  %v526_v54 = vld [vmem:[%s2661_s2 + $0x198] sm:$0xff] }
  0xcd   :  { %606 = vperm.xlu2 %1534, %v488_v55  }
  0xce   :  { %601 = vperm.xlu1 %1533, %v487_v59   ;;  %596 = vperm.xlu0 %1532, %v486_v60   ;;  %v503_v60 = vld [vmem:[%s2661_s2 + $0xe0] sm:$0xff] }
  0xcf   :  { %v1903_v61 = vpop.permute.xlu2 %310 }
  0xd0   :  { %2682 = vst [vmem:[#allocation23_spill] sm:$0xff] %v1903_v61  ;;  %v1905_v1 = vpop.permute.xlu1 %260  ;;  %v1907_v2 = vpop.permute.xlu0 %255 }
  0xd1   :  { %2683 = vst [vmem:[#allocation24_spill] sm:$0xff] %v1905_v1  ;;  %v524_v1 = vld [vmem:[%s2661_s2 + $0x188] sm:$0xff] }
  0xd2   :  { %2684 = vst [vmem:[#allocation25_spill] sm:$0xff] %v1907_v2  ;;  %v523_v2 = vld [vmem:[%s2661_s2 + $0x180] sm:$0xff] }
  0xd5   :  { %621 = vperm.xlu2 %1534, %v491_v3   ;;  %v502_v3 = vld [vmem:[%s2661_s2 + $0xd8] sm:$0xff] }
  0xd6   :  { %616 = vperm.xlu1 %1533, %v490_v7   ;;  %611 = vperm.xlu0 %1532, %v489_v8   ;;  %v501_v7 = vld [vmem:[%s2661_s2 + $0xd0] sm:$0xff] }
  0xd7   :  { %v1918_v9 = vpop.permute.xlu2 %325 }
  0xd8   :  { %v1920_v13 = vpop.permute.xlu1 %275  ;;  %v1922_v14 = vpop.permute.xlu0 %270 }
  0xd9   :  { %2685 = vst [vmem:[#allocation26_spill] sm:$0xff] %v1920_v13  ;;  %v521_v13 = vld [vmem:[%s2661_s2 + $0x170] sm:$0xff] }
  0xda   :  { %2686 = vst [vmem:[#allocation27_spill] sm:$0xff] %v1922_v14  ;;  %v520_v14 = vld [vmem:[%s2661_s2 + $0x168] sm:$0xff] }
  0xdd   :  { %636 = vperm.xlu2 %1534, %v494_v15  }
  0xde   :  { %631 = vperm.xlu1 %1533, %v493_v19   ;;  %626 = vperm.xlu0 %1532, %v492_v20   ;;  %v506_v20 = vld [vmem:[%s2661_s2 + $0xf8] sm:$0xff] }
  0xdf   :  { %v1933_v21 = vpop.permute.xlu2 %340 }
  0xe0   :  { %v1935_v25 = vpop.permute.xlu1 %290  ;;  %v1937_v26 = vpop.permute.xlu0 %285 }
  0xe1   :  { %2687 = vst [vmem:[#allocation28_spill] sm:$0xff] %v1935_v25  ;;  %v518_v25 = vld [vmem:[%s2661_s2 + $0x158] sm:$0xff] }
  0xe2   :  { %2688 = vst [vmem:[#allocation29_spill] sm:$0xff] %v1937_v26  ;;  %v517_v26 = vld [vmem:[%s2661_s2 + $0x150] sm:$0xff] }
  0xe5   :  { %651 = vperm.xlu2 %1534, %v497_v27   ;;  %v505_v27 = vld [vmem:[%s2661_s2 + $0xf0] sm:$0xff] }
  0xe6   :  { %646 = vperm.xlu1 %1533, %v496_v31   ;;  %641 = vperm.xlu0 %1532, %v495_v32   ;;  %v504_v31 = vld [vmem:[%s2661_s2 + $0xe8] sm:$0xff] }
  0xe7   :  { %v1948_v33 = vpop.permute.xlu2 %355 }
  0xe8   :  { %v1950_v37 = vpop.permute.xlu1 %305  ;;  %v1952_v39 = vpop.permute.xlu0 %300 }
  0xe9   :  { %2689 = vst [vmem:[#allocation30_spill] sm:$0xff] %v1950_v37  ;;  %v515_v37 = vld [vmem:[%s2661_s2 + $0x140] sm:$0xff] }
  0xea   :  { %2690 = vst [vmem:[#allocation31_spill] sm:$0xff] %v1952_v39  ;;  %v514_v39 = vld [vmem:[%s2661_s2 + $0x138] sm:$0xff] }
  0xed   :  { %666 = vperm.xlu2 %1534, %v500_v40  }
  0xee   :  { %661 = vperm.xlu1 %1533, %v499_v45   ;;  %656 = vperm.xlu0 %1532, %v498_v47   ;;  %v509_v47 = vld [vmem:[%s2661_s2 + $0x110] sm:$0xff] }
  0xef   :  { %v1963_v48 = vpop.permute.xlu2 %370 }
  0xf0   :  { %v1965_v55 = vpop.permute.xlu1 %320  ;;  %v1967_v59 = vpop.permute.xlu0 %315 }
  0xf1   :  { %2691 = vst [vmem:[#allocation32_spill] sm:$0xff] %v1967_v59  ;;  %v511_v59 = vld [vmem:[%s2661_s2 + $0x120] sm:$0xff] }
  0xf5   :  { %681 = vperm.xlu2 %1534, %v503_v60   ;;  %v508_v60 = vld [vmem:[%s2661_s2 + $0x108] sm:$0xff] }
  0xf6   :  { %676 = vperm.xlu1 %1533, %v502_v3   ;;  %671 = vperm.xlu0 %1532, %v501_v7   ;;  %v507_v3 = vld [vmem:[%s2661_s2 + $0x100] sm:$0xff] }
  0xf7   :  { %v1978_v8 = vpop.permute.xlu2 %385 }
  0xf8   :  { %v1980_v15 = vpop.permute.xlu1 %335  ;;  %v1982_v19 = vpop.permute.xlu0 %330 }
  0xfd   :  { %696 = vperm.xlu2 %1534, %v506_v20  }
  0xfe   :  { %691 = vperm.xlu1 %1533, %v505_v27   ;;  %686 = vperm.xlu0 %1532, %v504_v31   ;;  %v512_v31 = vld [vmem:[%s2661_s2 + $0x128] sm:$0xff] }
  0xff   :  { %v1993_v32 = vpop.permute.xlu2 %400 }
 0x100   :  { %v1995_v40 = vpop.permute.xlu1 %350  ;;  %v1997_v45 = vpop.permute.xlu0 %345 }
 0x105   :  { %711 = vperm.xlu2 %1534, %v509_v47   ;;  %v510_v47 = vld [vmem:[%s2661_s2 + $0x118] sm:$0xff] }
 0x106   :  { %706 = vperm.xlu1 %1533, %v508_v60   ;;  %701 = vperm.xlu0 %1532, %v507_v3  }
 0x107   :  { %v2008_v7 = vpop.permute.xlu2 %546 }
 0x108   :  { %v2010_v20 = vpop.permute.xlu1 %365  ;;  %v2012_v27 = vpop.permute.xlu0 %360 }
 0x10d   :  { %726 = vperm.xlu2 %1534, %v512_v31   ;;  %v513_v31 = vld [vmem:[%s2661_s2 + $0x130] sm:$0xff] }
 0x10e   :  { %721 = vperm.xlu1 %1533, %v511_v59   ;;  %716 = vperm.xlu0 %1532, %v510_v47  }
 0x10f   :  { %v2023_v60 = vpop.permute.xlu2 %561 }
 0x110   :  { %v2025_v3 = vpop.permute.xlu1 %380  ;;  %v2027_v61 = vpop.permute.xlu0 %375 }
 0x115   :  { %741 = vperm.xlu2 %1534, %v515_v37   ;;  %v516_v37 = vld [vmem:[%s2661_s2 + $0x148] sm:$0xff] }
 0x116   :  { %736 = vperm.xlu1 %1533, %v514_v39   ;;  %731 = vperm.xlu0 %1532, %v513_v31  }
 0x117   :  { %v2038_v59 = vpop.permute.xlu2 %576 }
 0x118   :  { %v2040_v47 = vpop.permute.xlu1 %395  ;;  %v2042_v49 = vpop.permute.xlu0 %390 }
 0x11d   :  { %756 = vperm.xlu2 %1534, %v518_v25   ;;  %v519_v25 = vld [vmem:[%s2661_s2 + $0x160] sm:$0xff] }
 0x11e   :  { %751 = vperm.xlu1 %1533, %v517_v26   ;;  %746 = vperm.xlu0 %1532, %v516_v37  }
 0x11f   :  { %v2053_v39 = vpop.permute.xlu2 %591 }
 0x120   :  { %v2055_v31 = vpop.permute.xlu1 %541  ;;  %v2057_v41 = vpop.permute.xlu0 %405 }
 0x125   :  { %771 = vperm.xlu2 %1534, %v521_v13   ;;  %v522_v13 = vld [vmem:[%s2661_s2 + $0x178] sm:$0xff] }
 0x126   :  { %766 = vperm.xlu1 %1533, %v520_v14   ;;  %761 = vperm.xlu0 %1532, %v519_v25  }
 0x127   :  { %v2068_v26 = vpop.permute.xlu2 %606 }
 0x128   :  { %v2070_v37 = vpop.permute.xlu1 %556  ;;  %v2072_v34 = vpop.permute.xlu0 %551 }
 0x12d   :  { %786 = vperm.xlu2 %1534, %v524_v1   ;;  %v525_v1 = vld [vmem:[%s2661_s2 + $0x190] sm:$0xff] }
 0x12e   :  { %781 = vperm.xlu1 %1533, %v523_v2   ;;  %776 = vperm.xlu0 %1532, %v522_v13  }
 0x12f   :  { %v2083_v14 = vpop.permute.xlu2 %621 }
 0x130   :  { %v2085_v25 = vpop.permute.xlu1 %571  ;;  %v2087_v28 = vpop.permute.xlu0 %566 }
 0x135   :  { %801 = vperm.xlu2 %1534, %v527_v53   ;;  %v528_v53 = vld [vmem:[%s2661_s2 + $0x1a8] sm:$0xff] }
 0x136   :  { %796 = vperm.xlu1 %1533, %v526_v54   ;;  %791 = vperm.xlu0 %1532, %v525_v1  }
 0x137   :  { %v2098_v2 = vpop.permute.xlu2 %636 }
 0x138   :  { %2692 = vst [vmem:[#allocation33_spill] sm:$0xff] %v2098_v2  ;;  %v2100_v13 = vpop.permute.xlu1 %586  ;;  %v2102_v22 = vpop.permute.xlu0 %581  ;;  %v538_v2 = vld [vmem:[%s2661_s2 + $0x1f8] sm:$0xff] }
 0x13d   :  { %816 = vperm.xlu2 %1534, %v530_v43   ;;  %v531_v43 = vld [vmem:[%s2661_s2 + $0x1c0] sm:$0xff] }
 0x13e   :  { %811 = vperm.xlu1 %1533, %v529_v44   ;;  %806 = vperm.xlu0 %1532, %v528_v53  }
 0x13f   :  { %v2113_v54 = vpop.permute.xlu2 %651 }
 0x140   :  { %2693 = vst [vmem:[#allocation34_spill] sm:$0xff] %v2113_v54  ;;  %v2115_v1 = vpop.permute.xlu1 %601  ;;  %v2117_v16 = vpop.permute.xlu0 %596 }
 0x145   :  { %831 = vperm.xlu2 %1534, %v533_v35   ;;  %v534_v35 = vld [vmem:[%s2661_s2 + $0x1d8] sm:$0xff] }
 0x146   :  { %826 = vperm.xlu1 %1533, %v532_v36   ;;  %821 = vperm.xlu0 %1532, %v531_v43  }
 0x147   :  { %v2128_v44 = vpop.permute.xlu2 %666 }
 0x148   :  { %2694 = vst [vmem:[#allocation35_spill] sm:$0xff] %v2128_v44  ;;  %v2130_v53 = vpop.permute.xlu1 %616  ;;  %v2132_v54 = vpop.permute.xlu0 %611 }
 0x14d   :  { %846 = vperm.xlu2 %1534, %v536_v10   ;;  %v537_v10 = vld [vmem:[%s2661_s2 + $0x1f0] sm:$0xff] }
 0x14e   :  { %841 = vperm.xlu1 %1533, %v535_v29   ;;  %836 = vperm.xlu0 %1532, %v534_v35  }
 0x14f   :  { %v2143_v36 = vpop.permute.xlu2 %681 }
 0x150   :  { %2695 = vst [vmem:[#allocation36_spill] sm:$0xff] %v2143_v36  ;;  %v2145_v43 = vpop.permute.xlu1 %631  ;;  %v2147_v44 = vpop.permute.xlu0 %626 }
 0x151   :  { %2696 = vst [vmem:[#allocation37_spill] sm:$0xff] %v2145_v43 }
 0x152   :  { %2697 = vst [vmem:[#allocation38_spill] sm:$0xff] %v2147_v44  ;;  %v1005_v44 = vld [vmem:[%s2662_s3 + $0x90] sm:$0xff] }
 0x155   :  { %1053 = vperm.xlu2 %1534, %v987_v30   ;;  %v988_v30 = vld [vmem:[%s2662_s3 + $0x8] sm:$0xff] }
 0x156   :  { %856 = vperm.xlu1 %1533, %v538_v2   ;;  %851 = vperm.xlu0 %1532, %v537_v10  }
 0x157   :  { %v2158_v29 = vpop.permute.xlu2 %696 }
 0x158   :  { %2698 = vst [vmem:[#allocation39_spill] sm:$0xff] %v2158_v29  ;;  %v2160_v35 = vpop.permute.xlu1 %646  ;;  %v2162_v36 = vpop.permute.xlu0 %641 }
 0x159   :  { %2699 = vst [vmem:[#allocation40_spill] sm:$0xff] %v2160_v35  ;;  %v993_v35 = vld [vmem:[%s2662_s3 + $0x30] sm:$0xff] }
 0x15a   :  { %2700 = vst [vmem:[#allocation41_spill] sm:$0xff] %v2162_v36  ;;  %v992_v36 = vld [vmem:[%s2662_s3 + $0x28] sm:$0xff] }
 0x15d   :  { %1068 = vperm.xlu2 %1534, %v990_v4   ;;  %v991_v4 = vld [vmem:[%s2662_s3 + $0x20] sm:$0xff] }
 0x15e   :  { %1063 = vperm.xlu1 %1533, %v989_v23   ;;  %1058 = vperm.xlu0 %1532, %v988_v30  }
 0x15f   :  { %v2173_v2 = vpop.permute.xlu2 %711 }
 0x160   :  { %2701 = vst [vmem:[#allocation42_spill] sm:$0xff] %v2173_v2  ;;  %v2175_v10 = vpop.permute.xlu1 %661  ;;  %v2177_v29 = vpop.permute.xlu0 %656 }
 0x161   :  { %2702 = vst [vmem:[#allocation43_spill] sm:$0xff] %v2175_v10  ;;  %v996_v10 = vld [vmem:[%s2662_s3 + $0x48] sm:$0xff] }
 0x162   :  { %2703 = vst [vmem:[#allocation44_spill] sm:$0xff] %v2177_v29  ;;  %v995_v29 = vld [vmem:[%s2662_s3 + $0x40] sm:$0xff] }
 0x165   :  { %1083 = vperm.xlu2 %1534, %v993_v35   ;;  %v994_v35 = vld [vmem:[%s2662_s3 + $0x38] sm:$0xff] }
 0x166   :  { %1078 = vperm.xlu1 %1533, %v992_v36   ;;  %1073 = vperm.xlu0 %1532, %v991_v4  }
 0x167   :  { %v2188_v23 = vpop.permute.xlu2 %726 }
 0x168   :  { %2704 = vst [vmem:[#allocation45_spill] sm:$0xff] %v2188_v23  ;;  %v2190_v30 = vpop.permute.xlu1 %676  ;;  %v2192_v2 = vpop.permute.xlu0 %671 }
 0x169   :  { %2705 = vst [vmem:[#allocation46_spill] sm:$0xff] %v2190_v30  ;;  %v999_v30 = vld [vmem:[%s2662_s3 + $0x60] sm:$0xff] }
 0x16a   :  { %2706 = vst [vmem:[#allocation47_spill] sm:$0xff] %v2192_v2  ;;  %v998_v2 = vld [vmem:[%s2662_s3 + $0x58] sm:$0xff] }
 0x16d   :  { %1098 = vperm.xlu2 %1534, %v996_v10   ;;  %v997_v10 = vld [vmem:[%s2662_s3 + $0x50] sm:$0xff] }
 0x16e   :  { %1093 = vperm.xlu1 %1533, %v995_v29   ;;  %1088 = vperm.xlu0 %1532, %v994_v35  }
 0x16f   :  { %v2203_v36 = vpop.permute.xlu2 %741 }
 0x170   :  { %2707 = vst [vmem:[#allocation48_spill] sm:$0xff] %v2203_v36  ;;  %v2205_v4 = vpop.permute.xlu1 %691  ;;  %v2207_v23 = vpop.permute.xlu0 %686 }
 0x171   :  { %2708 = vst [vmem:[#allocation49_spill] sm:$0xff] %v2205_v4  ;;  %v1002_v4 = vld [vmem:[%s2662_s3 + $0x78] sm:$0xff] }
 0x172   :  { %2709 = vst [vmem:[#allocation50_spill] sm:$0xff] %v2207_v23  ;;  %v1001_v23 = vld [vmem:[%s2662_s3 + $0x70] sm:$0xff] }
 0x175   :  { %1113 = vperm.xlu2 %1534, %v999_v30   ;;  %v1000_v30 = vld [vmem:[%s2662_s3 + $0x68] sm:$0xff] }
 0x176   :  { %1108 = vperm.xlu1 %1533, %v998_v2   ;;  %1103 = vperm.xlu0 %1532, %v997_v10   ;;  %v2236_v2 = vld [vmem:[%s2659_s0] ss:$0 sm:$0xff] }
 0x177   :  { %v2218_v29 = vpop.permute.xlu2 %756  ;;  %v457_v10 = vmul.f32 %v2236_v2, %v1965_v55  ;;  %v1003_v55 = vld [vmem:[%s2662_s3 + $0x80] sm:$0xff] }
 0x178   :  { %2710 = vst [vmem:[#allocation51_spill] sm:$0xff] %v2218_v29  ;;  %v2220_v35 = vpop.permute.xlu1 %706  ;;  %v2222_v36 = vpop.permute.xlu0 %701 }
 0x179   :  { %2711 = vst [vmem:[#allocation52_spill] sm:$0xff] %v2220_v35 }
 0x17a   :  { %2712 = vst [vmem:[#allocation53_spill] sm:$0xff] %v2222_v36 }
 0x17d   :  { %1128 = vperm.xlu2 %1534, %v1002_v4   ;;  %v1004_v4 = vld [vmem:[%s2662_s3 + $0x88] sm:$0xff] }
 0x17e   :  { %1123 = vperm.xlu1 %1533, %v1001_v23   ;;  %1118 = vperm.xlu0 %1532, %v1000_v30   ;;  %v460_v23 = vmul.f32 %v2236_v2, %v1980_v15  ;;  %v1006_v15 = vld [vmem:[%s2662_s3 + $0x98] sm:$0xff] }
 0x17f   :  { %v772_v29 = vpop.permute.xlu2 %771 }
 0x180   :  { %v2240_v35 = vadd.f32 %v772_v29, %v457_v10  ;;  %v2242_v36 = vpop.permute.xlu1 %721  ;;  %v2244_v43 = vpop.permute.xlu0 %716 }
 0x181   :  { %2714 = vst [vmem:[#allocation55_spill] sm:$0xff] %v2242_v36  ;;  %v1008_v36 = vld [vmem:[%s2662_s3 + $0xa8] sm:$0xff] }
 0x182   :  { %2713 = vst [vmem:[#allocation54_spill] sm:$0xff] %v2240_v35 }
 0x185   :  { %1143 = vperm.xlu2 %1534, %v1005_v44   ;;  %v1007_v44 = vld [vmem:[%s2662_s3 + $0xa0] sm:$0xff] }
 0x186   :  { %1138 = vperm.xlu1 %1533, %v1004_v4   ;;  %1133 = vperm.xlu0 %1532, %v1003_v55   ;;  %v463_v4 = vmul.f32 %v2236_v2, %v1995_v40  ;;  %v1009_v40 = vld [vmem:[%s2662_s3 + $0xb0] sm:$0xff] }
 0x187   :  { %v787_v29 = vpop.permute.xlu2 %786 }
 0x188   :  { %v2257_v30 = vadd.f32 %v787_v29, %v460_v23  ;;  %v2259_v10 = vpop.permute.xlu1 %736  ;;  %v2261_v35 = vpop.permute.xlu0 %731 }
 0x189   :  { %2716 = vst [vmem:[#allocation57_spill] sm:$0xff] %v2259_v10  ;;  %v1011_v10 = vld [vmem:[%s2662_s3 + $0xc0] sm:$0xff] }
 0x18a   :  { %2715 = vst [vmem:[#allocation56_spill] sm:$0xff] %v2257_v30 }
 0x18b   :  { %2717 = vst [vmem:[#allocation58_spill] sm:$0xff] %v2261_v35 }
 0x18d   :  { %1158 = vperm.xlu2 %1534, %v1008_v36   ;;  %v1010_v36 = vld [vmem:[%s2662_s3 + $0xb8] sm:$0xff] }
 0x18e   :  { %1153 = vperm.xlu1 %1533, %v1007_v44   ;;  %1148 = vperm.xlu0 %1532, %v1006_v15   ;;  %v466_v44 = vmul.f32 %v2236_v2, %v2010_v20  ;;  %v1012_v20 = vld [vmem:[%s2662_s3 + $0xc8] sm:$0xff] }
 0x18f   :  { %v802_v55 = vpop.permute.xlu2 %801 }
 0x190   :  { %v2274_v23 = vadd.f32 %v802_v55, %v463_v4  ;;  %v2276_v29 = vpop.permute.xlu1 %751  ;;  %v2278_v30 = vpop.permute.xlu0 %746 }
 0x191   :  { %2719 = vst [vmem:[#allocation60_spill] sm:$0xff] %v2276_v29  ;;  %v1014_v29 = vld [vmem:[%s2662_s3 + $0xd8] sm:$0xff] }
 0x192   :  { %2718 = vst [vmem:[#allocation59_spill] sm:$0xff] %v2274_v23 }
 0x193   :  { %2720 = vst [vmem:[#allocation61_spill] sm:$0xff] %v2278_v30 }
 0x195   :  { %1173 = vperm.xlu2 %1534, %v1011_v10   ;;  %v1013_v10 = vld [vmem:[%s2662_s3 + $0xd0] sm:$0xff] }
 0x196   :  { %1168 = vperm.xlu1 %1533, %v1010_v36   ;;  %1163 = vperm.xlu0 %1532, %v1009_v40   ;;  %v469_v36 = vmul.f32 %v2236_v2, %v2025_v3  ;;  %v458_v40 = vmul.f32 %v2236_v2, %v1918_v9  ;;  %v1017_v3 = vld [vmem:[%s2662_s3 + $0xf0] sm:$0xff]  ;;  %v1016_v9 = vld [vmem:[%s2662_s3 + $0xe8] sm:$0xff] }
 0x197   :  { %v817_v15 = vpop.permute.xlu2 %816 }
 0x198   :  { %v2291_v4 = vadd.f32 %v817_v15, %v466_v44  ;;  %v2293_v55 = vpop.permute.xlu1 %766  ;;  %v2295_v23 = vpop.permute.xlu0 %761  ;;  %v459_v44 = vmul.f32 %v2236_v2, %v1982_v19  ;;  %v1015_v19 = vld [vmem:[%s2662_s3 + $0xe0] sm:$0xff] }
 0x199   :  { %2722 = vst [vmem:[#allocation63_spill] sm:$0xff] %v2293_v55 }
 0x19a   :  { %2721 = vst [vmem:[#allocation62_spill] sm:$0xff] %v2291_v4 }
 0x19b   :  { %2723 = vst [vmem:[#allocation64_spill] sm:$0xff] %v2295_v23 }
 0x19d   :  { %1188 = vperm.xlu2 %1534, %v1014_v29   ;;  %v472_v29 = vmul.f32 %v2236_v2, %v2040_v47  ;;  %v1020_v47 = vld [vmem:[%s2662_s3 + $0x108] sm:$0xff] }
 0x19e   :  { %1183 = vperm.xlu1 %1533, %v1013_v10   ;;  %1178 = vperm.xlu0 %1532, %v1012_v20  }
 0x19f   :  { %v832_v15 = vpop.permute.xlu2 %831 }
 0x1a0   :  { %v2312_v4 = vadd.f32 %v832_v15, %v469_v36  ;;  %v782_v55 = vpop.permute.xlu1 %781  ;;  %v777_v23 = vpop.permute.xlu0 %776 }
 0x1a1   :  { %v2314_v30 = vadd.f32 %v782_v55, %v459_v44  ;;  %v2316_v35 = vadd.f32 %v777_v23, %v458_v40  ;;  %v461_v23 = vmul.f32 %v2236_v2, %v1933_v21  ;;  %v462_v55 = vmul.f32 %v2236_v2, %v1997_v45  ;;  %v1019_v21 = vld [vmem:[%s2662_s3 + $0x100] sm:$0xff]  ;;  %v1018_v45 = vld [vmem:[%s2662_s3 + $0xf8] sm:$0xff] }
 0x1a5   :  { %1203 = vperm.xlu2 %1534, %v1017_v3   ;;  %v464_v3 = vmul.f32 %v2236_v2, %v1948_v33  ;;  %v1021_v33 = vld [vmem:[%s2662_s3 + $0x110] sm:$0xff] }
 0x1a6   :  { %1198 = vperm.xlu1 %1533, %v1016_v9   ;;  %1193 = vperm.xlu0 %1532, %v1015_v19   ;;  %v465_v9 = vmul.f32 %v2236_v2, %v2012_v27  ;;  %v467_v27 = vmul.f32 %v2236_v2, %v1963_v48  ;;  %v470_v48 = vmul.f32 %v2236_v2, %v1978_v8 }
 0x1a7   :  { %v847_v10 = vpop.permute.xlu2 %846  ;;  %v473_v8 = vmul.f32 %v2236_v2, %v1993_v32  ;;  %v1032_v32 = vld [vmem:[%s2662_s3 + $0x168] sm:$0xff] }
 0x1a8   :  { %v2333_v20 = vadd.f32 %v847_v10, %v472_v29  ;;  %v797_v36 = vpop.permute.xlu1 %796  ;;  %v792_v40 = vpop.permute.xlu0 %791 }
 0x1a9   :  { %v2335_v44 = vadd.f32 %v797_v36, %v462_v55  ;;  %v2337_v15 = vadd.f32 %v792_v40, %v461_v23  ;;  %v1023_v36 = vld [vmem:[%s2662_s3 + $0x120] sm:$0xff]  ;;  %v1022_v40 = vld [vmem:[%s2662_s3 + $0x118] sm:$0xff] }
 0x1aa   :  { %2724 = vst [vmem:[#allocation65_spill] sm:$0xff] %v2333_v20  ;;  %v412_v20 = vmul.f32 %v2236_v2, %v1757_v58  ;;  %v1030_v58 = vld [vmem:[%s2662_s3 + $0x158] sm:$0xff] }
 0x1ad   :  { %1218 = vperm.xlu2 %1534, %v1020_v47   ;;  %v468_v47 = vmul.f32 %v2236_v2, %v2027_v61  ;;  %v1024_v61 = vld [vmem:[%s2662_s3 + $0x128] sm:$0xff] }
 0x1ae   :  { %1213 = vperm.xlu1 %1533, %v1019_v21   ;;  %1208 = vperm.xlu0 %1532, %v1018_v45  }
 0x1af   :  { %v2352_v19 = vpop.permute.xlu2 %1053 }
 0x1b0   :  { %v812_v29 = vpop.permute.xlu1 %811  ;;  %v807_v23 = vpop.permute.xlu0 %806 }
 0x1b1   :  { %v2354_v55 = vadd.f32 %v812_v29, %v465_v9  ;;  %v2356_v10 = vadd.f32 %v807_v23, %v464_v3  ;;  %v1026_v23 = vld [vmem:[%s2662_s3 + $0x138] sm:$0xff] }
 0x1b5   :  { %1233 = vperm.xlu2 %1534, %v1023_v36   ;;  %v1025_v36 = vld [vmem:[%s2662_s3 + $0x130] sm:$0xff] }
 0x1b6   :  { %1228 = vperm.xlu1 %1533, %v1022_v40   ;;  %1223 = vperm.xlu0 %1532, %v1021_v33   ;;  %v471_v40 = vmul.f32 %v2236_v2, %v2042_v49  ;;  %v1027_v49 = vld [vmem:[%s2662_s3 + $0x140] sm:$0xff] }
 0x1b7   :  { %v2371_v21 = vpop.permute.xlu2 %1068 }
 0x1b8   :  { %v827_v45 = vpop.permute.xlu1 %826  ;;  %v822_v3 = vpop.permute.xlu0 %821 }
 0x1b9   :  { %v2373_v9 = vadd.f32 %v827_v45, %v468_v47  ;;  %v2375_v29 = vadd.f32 %v822_v3, %v467_v27 }
 0x1bd   :  { %1248 = vperm.xlu2 %1534, %v1026_v23   ;;  %v1029_v23 = vld [vmem:[%s2662_s3 + $0x150] sm:$0xff] }
 0x1be   :  { %1243 = vperm.xlu1 %1533, %v1025_v36   ;;  %1238 = vperm.xlu0 %1532, %v1024_v61   ;;  %v1028_v36 = vld [vmem:[%s2662_s3 + $0x148] sm:$0xff]  ;;  %v474_v61 = vmul.f32 %v2236_v2, %v2057_v41  ;;  %v413_v41 = vmul.f32 %v2236_v2, %v1740_v51 }
 0x1bf   :  { %v2390_v33 = vpop.permute.xlu2 %1083 }
 0x1c0   :  { %v842_v27 = vpop.permute.xlu1 %841  ;;  %v837_v47 = vpop.permute.xlu0 %836 }
 0x1c1   :  { %v2392_v45 = vadd.f32 %v842_v27, %v471_v40  ;;  %v2394_v3 = vadd.f32 %v837_v47, %v470_v48  ;;  %v411_v47 = vmul.f32 %v2236_v2, %v1742_v52  ;;  %v1031_v52 = vld [vmem:[%s2662_s3 + $0x160] sm:$0xff] }
 0x1c3   :  { %2725 = vst [vmem:[#allocation66_spill] sm:$0xff] %v2392_v45 }
 0x1c5   :  { %1263 = vperm.xlu2 %1534, %v1029_v23  }
 0x1c6   :  { %1258 = vperm.xlu1 %1533, %v1028_v36   ;;  %1253 = vperm.xlu0 %1532, %v1027_v49   ;;  %v860_v36 = vadd.f32 %v2008_v7, %v412_v20  ;;  %v859_v49 = vadd.f32 %v2055_v31, %v411_v47  ;;  %v415_v47 = vmul.f32 %v2236_v2, %v1705_v38  ;;  %v1034_v38 = vld [vmem:[%s2662_s3 + $0x178] sm:$0xff] }
 0x1c7   :  { %v2409_v48 = vpop.permute.xlu2 %1098 }
 0x1c8   :  { %v857_v40 = vpop.permute.xlu1 %856  ;;  %v852_v27 = vpop.permute.xlu0 %851  ;;  %v924_v51 = vmax.f32 %v860_v36, 0.0  ;;  %v923_v7 = vmax.f32 %v859_v49, 0.0 }
 0x1c9   :  { %v2415_v45 = vadd.f32 %v857_v40, %v474_v61  ;;  %v2417_v23 = vadd.f32 %v852_v27, %v473_v8  ;;  %v414_v8 = vmul.f32 %v2236_v2, %v1755_v57  ;;  %v861_v61 = vadd.f32 %v2072_v34, %v413_v41 }
 0x1ca   :  { %v416_v34 = vmul.f32 %v2236_v2, %v1716_v42  ;;  %v417_v42 = vmul.f32 %v2236_v2, %v1772_v0 }
 0x1cb   :  { %2726 = vst [vmem:[#allocation67_spill] sm:$0xff] %v2415_v45  ;;  %v862_v31 = vadd.f32 %v2070_v37, %v414_v8  ;;  %v925_v45 = vmax.f32 %v861_v61, 0.0  ;;  %v863_v37 = vadd.f32 %v2023_v60, %v415_v47 }
 0x1cc   :  { %2727 = vst [vmem:[#allocation68_spill] sm:$0xff] %v2417_v23  ;;  %v1371_v23 = vmul.f32 %v2352_v19, %v923_v7  ;;  %v1033_v19 = vld [vmem:[%s2662_s3 + $0x170] sm:$0xff] }
 0x1cd   :  { %1278 = vperm.xlu2 %1534, %v1032_v32   ;;  %v1035_v32 = vld [vmem:[%s2662_s3 + $0x180] sm:$0xff]  ;;  %v926_v41 = vmax.f32 %v862_v31, 0.0  ;;  %v927_v60 = vmax.f32 %v863_v37, 0.0  ;;  %v418_v31 = vmul.f32 %v2236_v2, %v1770_v63  ;;  %v1036_v63 = vld [vmem:[%s2662_s3 + $0x188] sm:$0xff] }
 0x1ce   :  { %1273 = vperm.xlu1 %1533, %v1031_v52   ;;  %1268 = vperm.xlu0 %1532, %v1030_v58   ;;  %v864_v52 = vadd.f32 %v2087_v28, %v416_v34  ;;  %v419_v28 = vmul.f32 %v2236_v2, %v1727_v46  ;;  %v1037_v34 = vld [vmem:[%s2662_s3 + $0x190] sm:$0xff]  ;;  %v420_v46 = vmul.f32 %v2236_v2, %v1787_v6 }
 0x1cf   :  { %v2436_v20 = vpop.permute.xlu2 %1113  ;;  %v1374_v58 = vmul.f32 %v2371_v21, %v926_v41  ;;  %v1038_v21 = vld [vmem:[%s2662_s3 + $0x198] sm:$0xff] }
 0x1d0   :  { %v1064_v40 = vpop.permute.xlu1 %1063  ;;  %v1059_v27 = vpop.permute.xlu0 %1058  ;;  %v928_v0 = vmax.f32 %v864_v52, 0.0  ;;  %v421_v52 = vmul.f32 %v2236_v2, %v1785_v5  ;;  %v1039_v5 = vld [vmem:[%s2662_s3 + $0x1a0] sm:$0xff] }
 0x1d1   :  { %v1372_v57 = vmul.f32 %v1059_v27, %v924_v51  ;;  %v1373_v36 = vmul.f32 %v1064_v40, %v925_v45  ;;  %v865_v45 = vadd.f32 %v2085_v25, %v417_v42  ;;  %v866_v27 = vadd.f32 %v2038_v59, %v418_v31 }
 0x1d3   :  { %v1435_v49 = vadd.f32 %v1372_v57, %v1371_v23  ;;  %v929_v25 = vmax.f32 %v865_v45, 0.0  ;;  %v930_v59 = vmax.f32 %v866_v27, 0.0 }
 0x1d5   :  { %v1436_v8 = vadd.f32 %v1435_v49, %v1373_v36  ;;  %1293 = vperm.xlu2 %1534, %v1035_v32   ;;  %v867_v32 = vadd.f32 %v2102_v22, %v419_v28  ;;  %v1377_v37 = vmul.f32 %v2390_v33, %v929_v25  ;;  %v868_v36 = vadd.f32 %v2100_v13, %v420_v46  ;;  %v1041_v33 = vld [vmem:[%s2662_s3 + $0x1b0] sm:$0xff]  ;;  %v1043_v46 = vld [vmem:[%s2662_s3 + $0x1c0] sm:$0xff] }
 0x1d6   :  { %1288 = vperm.xlu1 %1533, %v1034_v38   ;;  %1283 = vperm.xlu0 %1532, %v1033_v19   ;;  %v422_v22 = vmul.f32 %v2236_v2, %v1738_v50  ;;  %v423_v50 = vmul.f32 %v2236_v2, %v1802_v12  ;;  %v424_v25 = vmul.f32 %v2236_v2, %v1800_v11  ;;  %v1042_v11 = vld [vmem:[%s2662_s3 + $0x1b8] sm:$0xff] }
 0x1d7   :  { %v2458_v23 = vpop.permute.xlu2 %1128  ;;  %v1437_v61 = vadd.f32 %v1436_v8, %v1374_v58  ;;  %v931_v6 = vmax.f32 %v867_v32, 0.0  ;;  %v869_v8 = vadd.f32 %v2053_v39, %v421_v52  ;;  %v932_v13 = vmax.f32 %v868_v36, 0.0 }
 0x1d8   :  { %v1079_v51 = vpop.permute.xlu1 %1078  ;;  %v1074_v7 = vpop.permute.xlu0 %1073  ;;  %v427_v52 = vmul.f32 %v2236_v2, %v1815_v17  ;;  %v1045_v17 = vld [vmem:[%s2662_s3 + $0x1d0] sm:$0xff] }
 0x1d9   :  { %v1375_v40 = vmul.f32 %v1074_v7, %v927_v60  ;;  %v1376_v47 = vmul.f32 %v1079_v51, %v928_v0  ;;  %v870_v51 = vadd.f32 %v2117_v16, %v422_v22  ;;  %v1380_v7 = vmul.f32 %v2409_v48, %v932_v13  ;;  %v1044_v48 = vld [vmem:[%s2662_s3 + $0x1c8] sm:$0xff] }
 0x1da   :  { %v933_v39 = vmax.f32 %v869_v8, 0.0  ;;  %v871_v0 = vadd.f32 %v2115_v1, %v423_v50  ;;  %v425_v16 = vmul.f32 %v2236_v2, %v1753_v56  ;;  %v426_v56 = vmul.f32 %v2236_v2, %v1817_v18  ;;  %v1046_v8 = vld [vmem:[%s2662_s3 + $0x1d8] sm:$0xff]  ;;  %v2728_v13 = vld [vmem:[#allocation38_spill] sm:$0xff] }
 0x1db   :  { %v1438_v57 = vadd.f32 %v1437_v61, %v1375_v40  ;;  %v1040_v61 = vld [vmem:[%s2662_s3 + $0x1a8] sm:$0xff]  ;;  %v934_v12 = vmax.f32 %v870_v51, 0.0 }
 0x1dc   :  { %v935_v1 = vmax.f32 %v871_v0, 0.0  ;;  %v873_v32 = vadd.f32 %v2132_v54, %v425_v16  ;;  %v428_v54 = vmul.f32 %v2236_v2, %v1768_v62  ;;  %v429_v62 = vmul.f32 %v2236_v2, %v1832_v24 }
 0x1dd   :  { %v1439_v41 = vadd.f32 %v1438_v57, %v1376_v47  ;;  %1308 = vperm.xlu2 %1534, %v1038_v21   ;;  %v872_v57 = vadd.f32 %v2068_v26, %v424_v25  ;;  %v1050_v25 = vld [vmem:[%s2662_s3 + $0x1f8] sm:$0xff] }
 0x1de   :  { %1303 = vperm.xlu1 %1533, %v1037_v34   ;;  %1298 = vperm.xlu0 %1532, %v1036_v63   ;;  %v937_v18 = vmax.f32 %v873_v32, 0.0 }
 0x1df   :  { %v2479_v49 = vpop.permute.xlu2 %1143  ;;  %v1440_v38 = vadd.f32 %v1439_v41, %v1377_v37  ;;  %v1383_v37 = vmul.f32 %v2436_v20, %v935_v1  ;;  %v936_v26 = vmax.f32 %v872_v57, 0.0  ;;  %v1047_v20 = vld [vmem:[%s2662_s3 + $0x1e0] sm:$0xff]  ;;  %v1049_v1 = vld [vmem:[%s2662_s3 + $0x1f0] sm:$0xff] }
 0x1e0   :  { %v1094_v19 = vpop.permute.xlu1 %1093  ;;  %v1089_v42 = vpop.permute.xlu0 %1088 }
 0x1e1   :  { %v1378_v58 = vmul.f32 %v1089_v42, %v930_v59  ;;  %v1379_v60 = vmul.f32 %v1094_v19, %v931_v6  ;;  %v874_v59 = vadd.f32 %v2130_v53, %v426_v56 }
 0x1e3   :  { %v1441_v45 = vadd.f32 %v1440_v38, %v1378_v58  ;;  %v875_v58 = vadd.f32 %v2083_v14, %v427_v52  ;;  %v938_v53 = vmax.f32 %v874_v59, 0.0  ;;  %v2736_v52 = vld [vmem:[#allocation12_spill] sm:$0xff] }
 0x1e5   :  { %v1442_v31 = vadd.f32 %v1441_v45, %v1379_v60  ;;  %1323 = vperm.xlu2 %1534, %v1041_v33   ;;  %v876_v60 = vadd.f32 %v2728_v13, %v428_v54  ;;  %v1386_v45 = vmul.f32 %v2458_v23, %v938_v53  ;;  %v939_v14 = vmax.f32 %v875_v58, 0.0  ;;  %v2738_v53 = vld [vmem:[#allocation34_spill] sm:$0xff]  ;;  %v2739_v13 = vld [vmem:[#allocation16_spill] sm:$0xff] }
 0x1e6   :  { %1318 = vperm.xlu1 %1533, %v1040_v61   ;;  %1313 = vperm.xlu0 %1532, %v1039_v5   ;;  %v2729_v5 = vld [vmem:[#allocation37_spill] sm:$0xff] }
 0x1e7   :  { %v2500_v40 = vpop.permute.xlu2 %1158  ;;  %v1443_v28 = vadd.f32 %v1442_v31, %v1380_v7  ;;  %v877_v50 = vadd.f32 %v2729_v5, %v429_v62  ;;  %v1504_v62 = vld [vmem:[#allocation2] sm:$0x1] }
 0x1e8   :  { %v1109_v21 = vpop.permute.xlu1 %1108  ;;  %v1104_v27 = vpop.permute.xlu0 %1103 }
 0x1e9   :  { %v1381_v47 = vmul.f32 %v1104_v27, %v933_v39  ;;  %v1382_v34 = vmul.f32 %v1109_v21, %v934_v12  ;;  %v2730_v39 = vld [vmem:[#allocation10_spill] sm:$0xff]  ;;  %v2732_v12 = vld [vmem:[#allocation33_spill] sm:$0xff]  ;;  %v941_v16 = vmax.f32 %v877_v50, 0.0 }
 0x1ea   :  { %v430_v0 = vmul.f32 %v2236_v2, %v2730_v39  ;;  %v2731_v27 = vld [vmem:[#allocation6_spill] sm:$0xff] }
 0x1eb   :  { %v1444_v63 = vadd.f32 %v1443_v28, %v1381_v47  ;;  %v940_v28 = vmax.f32 %v876_v60, 0.0  ;;  %v431_v23 = vmul.f32 %v2236_v2, %v2731_v27  ;;  %v1389_v32 = vmul.f32 %v2479_v49, %v941_v16 }
 0x1ec   :  { %v878_v47 = vadd.f32 %v2732_v12, %v430_v0  ;;  %v435_v60 = vmul.f32 %v2236_v2, %v2739_v13 }
 0x1ed   :  { %v1445_v41 = vadd.f32 %v1444_v63, %v1382_v34  ;;  %1338 = vperm.xlu2 %1534, %v1044_v48   ;;  %v1048_v34 = vld [vmem:[%s2662_s3 + $0x1e8] sm:$0xff]  ;;  %v2733_v63 = vld [vmem:[#allocation13_spill] sm:$0xff]  ;;  %s1563_s3 = smov [#allocation3]  }
 0x1ee   :  { %1333 = vperm.xlu1 %1533, %v1043_v46   ;;  %1328 = vperm.xlu0 %1532, %v1042_v11   ;;  %v432_v46 = vmul.f32 %v2236_v2, %v2733_v63  ;;  %v2734_v11 = vld [vmem:[#allocation41_spill] sm:$0xff]  ;;  %v2746_v63 = vld [vmem:[#allocation47_spill] sm:$0xff]  ;;  %s1519_s24 = sshll.u32 %s1563_s3, 4  ;;  %s1520_s24 = int_to_ptr.vmem [resolvable:$true] %s1519_s24 }
 0x1ef   :  { %v2521_v36 = vpop.permute.xlu2 %1173  ;;  %v1446_v38 = vadd.f32 %v1445_v41, %v1383_v37  ;;  %v879_v56 = vadd.f32 %v2734_v11, %v431_v23  ;;  %v942_v41 = vmax.f32 %v878_v47, 0.0  ;;  %v2744_v47 = vld [vmem:[#allocation35_spill] sm:$0xff] }
 0x1f0   :  { %v1124_v19 = vpop.permute.xlu1 %1123  ;;  %v1119_v42 = vpop.permute.xlu0 %1118 }
 0x1f1   :  { %v1384_v6 = vmul.f32 %v1119_v42, %v936_v26  ;;  %v1385_v22 = vmul.f32 %v1124_v19, %v937_v18  ;;  %v2735_v26 = vld [vmem:[#allocation40_spill] sm:$0xff]  ;;  %v433_v18 = vmul.f32 %v2236_v2, %v2736_v52 }
 0x1f2   :  { %v880_v59 = vadd.f32 %v2735_v26, %v432_v46 }
 0x1f3   :  { %v1447_v33 = vadd.f32 %v1446_v38, %v1384_v6  ;;  %v943_v6 = vmax.f32 %v879_v56, 0.0  ;;  %v881_v49 = vadd.f32 %v2738_v53, %v433_v18 }
 0x1f5   :  { %v1448_v61 = vadd.f32 %v1447_v33, %v1385_v22  ;;  %1353 = vperm.xlu2 %1534, %v1047_v20   ;;  %v2737_v20 = vld [vmem:[#allocation7_spill] sm:$0xff]  ;;  %v944_v22 = vmax.f32 %v880_v59, 0.0  ;;  %v945_v50 = vmax.f32 %v881_v49, 0.0 }
 0x1f6   :  { %1348 = vperm.xlu1 %1533, %v1046_v8   ;;  %1343 = vperm.xlu0 %1532, %v1045_v17   ;;  %v434_v58 = vmul.f32 %v2236_v2, %v2737_v20 }
 0x1f7   :  { %v1449_v51 = vadd.f32 %v1448_v61, %v1386_v45  ;;  %v2544_v21 = vpop.permute.xlu2 %1188  ;;  %v2740_v45 = vld [vmem:[#allocation44_spill] sm:$0xff] }
 0x1f8   :  { %v1139_v7 = vpop.permute.xlu1 %1138  ;;  %v1134_v31 = vpop.permute.xlu0 %1133  ;;  %v882_v61 = vadd.f32 %v2740_v45, %v434_v58  ;;  %v2750_v58 = vld [vmem:[#allocation36_spill] sm:$0xff] }
 0x1f9   :  { %v1387_v24 = vmul.f32 %v1134_v31, %v939_v14  ;;  %v1388_v48 = vmul.f32 %v1139_v7, %v940_v28  ;;  %v1392_v14 = vmul.f32 %v2500_v40, %v944_v22  ;;  %v2742_v28 = vld [vmem:[#allocation15_spill] sm:$0xff] }
 0x1fa   :  { %v946_v27 = vmax.f32 %v882_v61, 0.0 }
 0x1fb   :  { %v1450_v57 = vadd.f32 %v1449_v51, %v1387_v24  ;;  %v2741_v51 = vld [vmem:[#allocation43_spill] sm:$0xff]  ;;  %v436_v24 = vmul.f32 %v2236_v2, %v2742_v28 }
 0x1fc   :  { %v883_v7 = vadd.f32 %v2741_v51, %v435_v60 }
 0x1fd   :  { %v1451_v37 = vadd.f32 %v1450_v57, %v1388_v48  ;;  %1368 = vperm.xlu2 %1534, %v1050_v25   ;;  %v2743_v25 = vld [vmem:[#allocation8_spill] sm:$0xff]  ;;  %v884_v16 = vadd.f32 %v2744_v47, %v436_v24 }
 0x1fe   :  { %1363 = vperm.xlu1 %1533, %v1049_v1   ;;  %1358 = vperm.xlu0 %1532, %v1048_v34   ;;  %v437_v12 = vmul.f32 %v2236_v2, %v2743_v25  ;;  %v947_v48 = vmax.f32 %v883_v7, 0.0  ;;  %v2745_v1 = vld [vmem:[#allocation19_spill] sm:$0xff] }
 0x1ff   :  { %v1452_v38 = vadd.f32 %v1451_v37, %v1389_v32  ;;  %v1204_v33 = vpop.permute.xlu2 %1203  ;;  %v438_v34 = vmul.f32 %v2236_v2, %v2745_v1  ;;  %v948_v37 = vmax.f32 %v884_v16, 0.0  ;;  %v2756_v25 = vld [vmem:[#allocation39_spill] sm:$0xff] }
 0x200   :  { %v1154_v19 = vpop.permute.xlu1 %1153  ;;  %v1149_v42 = vpop.permute.xlu0 %1148  ;;  %v885_v46 = vadd.f32 %v2746_v63, %v437_v12  ;;  %v1395_v11 = vmul.f32 %v2521_v36, %v947_v48  ;;  %v2757_v48 = vld [vmem:[#allocation25_spill] sm:$0xff] }
 0x201   :  { %v1390_v54 = vmul.f32 %v1149_v42, %v942_v41  ;;  %v1391_v8 = vmul.f32 %v1154_v19, %v943_v6  ;;  %v2747_v41 = vld [vmem:[#allocation46_spill] sm:$0xff] }
 0x202   :  { %v886_v26 = vadd.f32 %v2747_v41, %v438_v34  ;;  %v2748_v42 = vld [vmem:[#allocation18_spill] sm:$0xff]  ;;  %v949_v18 = vmax.f32 %v885_v46, 0.0 }
 0x203   :  { %v1453_v17 = vadd.f32 %v1452_v38, %v1390_v54  ;;  %v439_v52 = vmul.f32 %v2236_v2, %v2748_v42  ;;  %v2749_v54 = vld [vmem:[#allocation9_spill] sm:$0xff] }
 0x204   :  { %v440_v20 = vmul.f32 %v2236_v2, %v2749_v54  ;;  %v950_v49 = vmax.f32 %v886_v26, 0.0  ;;  %v2762_v54 = vld [vmem:[#allocation42_spill] sm:$0xff] }
 0x205   :  { %v1454_v5 = vadd.f32 %v1453_v17, %v1391_v8  ;;  %v887_v53 = vadd.f32 %v2750_v58, %v439_v52  ;;  %v2751_v8 = vld [vmem:[#allocation22_spill] sm:$0xff] }
 0x206   :  { %1507 = vperm.xlu0 %1532, %v1504_v62   ;;  %v441_v17 = vmul.f32 %v2236_v2, %v2751_v8  ;;  %v2752_v62 = vld [vmem:[#allocation50_spill] sm:$0xff]  ;;  %v1398_v60 = vmul.f32 %v2544_v21, %v950_v49  ;;  %v2763_v49 = vld [vmem:[#allocation27_spill] sm:$0xff] }
 0x207   :  { %v1455_v31 = vadd.f32 %v1454_v5, %v1392_v14  ;;  %v1219_v56 = vpop.permute.xlu2 %1218  ;;  %v888_v13 = vadd.f32 %v2752_v62, %v440_v20  ;;  %v951_v61 = vmax.f32 %v887_v53, 0.0  ;;  %v2753_v14 = vld [vmem:[#allocation49_spill] sm:$0xff] }
 0x208   :  { %v1169_v39 = vpop.permute.xlu1 %1168  ;;  %v1164_v0 = vpop.permute.xlu0 %1163  ;;  %v889_v5 = vadd.f32 %v2753_v14, %v441_v17 }
 0x209   :  { %v1393_v23 = vmul.f32 %v1164_v0, %v945_v50  ;;  %v1394_v40 = vmul.f32 %v1169_v39, %v946_v27  ;;  %v2754_v39 = vld [vmem:[#allocation21_spill] sm:$0xff]  ;;  %v952_v28 = vmax.f32 %v888_v13, 0.0  ;;  %v2755_v27 = vld [vmem:[#allocation11_spill] sm:$0xff] }
 0x20a   :  { %v442_v0 = vmul.f32 %v2236_v2, %v2754_v39  ;;  %v953_v47 = vmax.f32 %v889_v5, 0.0  ;;  %v2764_v13 = vld [vmem:[#allocation55_spill] sm:$0xff]  ;;  %v2765_v5 = vld [vmem:[#allocation26_spill] sm:$0xff]  ;;  %v2766_v39 = vld [vmem:[#allocation17_spill] sm:$0xff] }
 0x20b   :  { %v1456_v57 = vadd.f32 %v1455_v31, %v1393_v23  ;;  %v443_v23 = vmul.f32 %v2236_v2, %v2755_v27 }
 0x20c   :  { %v890_v12 = vadd.f32 %v2756_v25, %v442_v0  ;;  %v1401_v34 = vmul.f32 %v1204_v33, %v953_v47  ;;  %v449_v0 = vmul.f32 %v2236_v2, %v2766_v39  ;;  %v2768_v25 = vld [vmem:[#allocation29_spill] sm:$0xff]  ;;  %v2769_v47 = vld [vmem:[#allocation58_spill] sm:$0xff] }
 0x20d   :  { %v1457_v32 = vadd.f32 %v1456_v57, %v1394_v40  ;;  %v444_v40 = vmul.f32 %v2236_v2, %v2757_v48  ;;  %v2758_v57 = vld [vmem:[#allocation53_spill] sm:$0xff] }
 0x20e   :  { %v891_v1 = vadd.f32 %v2758_v57, %v443_v23  ;;  %v954_v46 = vmax.f32 %v890_v12, 0.0  ;;  %v450_v12 = vmul.f32 %v2236_v2, %v2768_v25  ;;  %v2770_v57 = vld [vmem:[#allocation57_spill] sm:$0xff] }
 0x20f   :  { %v1458_v59 = vadd.f32 %v1457_v32, %v1395_v11  ;;  %v1234_v50 = vpop.permute.xlu2 %1233  ;;  %v2759_v11 = vld [vmem:[#allocation52_spill] sm:$0xff] }
 0x210   :  { %v1184_v38 = vpop.permute.xlu1 %1183  ;;  %v1179_v19 = vpop.permute.xlu0 %1178  ;;  %v892_v32 = vadd.f32 %v2759_v11, %v444_v40  ;;  %v2771_v11 = vld [vmem:[#allocation28_spill] sm:$0xff] }
 0x211   :  { %v1396_v6 = vmul.f32 %v1179_v19, %v948_v37  ;;  %v1397_v36 = vmul.f32 %v1184_v38, %v949_v18  ;;  %v955_v19 = vmax.f32 %v891_v1, 0.0  ;;  %v2761_v18 = vld [vmem:[#allocation14_spill] sm:$0xff]  ;;  %v898_v1 = vadd.f32 %v2770_v57, %v450_v12 }
 0x212   :  { %v956_v58 = vmax.f32 %v892_v32, 0.0  ;;  %v451_v32 = vmul.f32 %v2236_v2, %v2771_v11 }
 0x213   :  { %v1459_v22 = vadd.f32 %v1458_v59, %v1396_v6  ;;  %v2760_v59 = vld [vmem:[#allocation24_spill] sm:$0xff]  ;;  %v446_v6 = vmul.f32 %v2236_v2, %v2761_v18 }
 0x214   :  { %v445_v38 = vmul.f32 %v2236_v2, %v2760_v59  ;;  %v1404_v8 = vmul.f32 %v1219_v56, %v956_v58 }
 0x215   :  { %v1460_v45 = vadd.f32 %v1459_v22, %v1397_v36  ;;  %v447_v36 = vmul.f32 %v2236_v2, %v2763_v49  ;;  %v894_v22 = vadd.f32 %v2244_v43, %v446_v6  ;;  %v2774_v6 = vld [vmem:[#allocation31_spill] sm:$0xff] }
 0x216   :  { %v893_v20 = vadd.f32 %v2762_v54, %v445_v38  ;;  %v2773_v38 = vld [vmem:[#allocation48_spill] sm:$0xff]  ;;  %v453_v54 = vmul.f32 %v2236_v2, %v2774_v6 }
 0x217   :  { %v1461_v51 = vadd.f32 %v1460_v45, %v1398_v60  ;;  %v1249_v42 = vpop.permute.xlu2 %1248  ;;  %v895_v60 = vadd.f32 %v2764_v13, %v447_v36 }
 0x218   :  { %v1199_v7 = vpop.permute.xlu1 %1198  ;;  %v1194_v31 = vpop.permute.xlu0 %1193  ;;  %v957_v62 = vmax.f32 %v893_v20, 0.0  ;;  %v2775_v20 = vld [vmem:[#allocation61_spill] sm:$0xff] }
 0x219   :  { %v1399_v24 = vmul.f32 %v1194_v31, %v951_v61  ;;  %v1400_v21 = vmul.f32 %v1199_v7, %v952_v28  ;;  %v958_v7 = vmax.f32 %v894_v22, 0.0  ;;  %v2767_v28 = vld [vmem:[#allocation45_spill] sm:$0xff]  ;;  %v959_v27 = vmax.f32 %v895_v60, 0.0  ;;  %v2776_v22 = vld [vmem:[#allocation60_spill] sm:$0xff]  ;;  %v2777_v60 = vld [vmem:[#allocation30_spill] sm:$0xff] }
 0x21b   :  { %v1462_v16 = vadd.f32 %v1461_v51, %v1399_v24  ;;  %v448_v51 = vmul.f32 %v2236_v2, %v2765_v5  ;;  %v2778_v5 = vld [vmem:[#allocation23_spill] sm:$0xff] }
 0x21d   :  { %v1463_v63 = vadd.f32 %v1462_v16, %v1400_v21  ;;  %v896_v24 = vadd.f32 %v2767_v28, %v448_v51  ;;  %v897_v21 = vadd.f32 %v2769_v47, %v449_v0  ;;  %v1407_v16 = vmul.f32 %v1234_v50, %v959_v27  ;;  %v2780_v28 = vld [vmem:[#allocation32_spill] sm:$0xff]  ;;  %v2782_v47 = vld [vmem:[#allocation63_spill] sm:$0xff] }
 0x21e   :  { %v455_v51 = vmul.f32 %v2236_v2, %v2778_v5  ;;  %v2781_v27 = vld [vmem:[#allocation64_spill] sm:$0xff] }
 0x21f   :  { %v1464_v37 = vadd.f32 %v1463_v63, %v1401_v34  ;;  %v1264_v43 = vpop.permute.xlu2 %1263  ;;  %v960_v40 = vmax.f32 %v896_v24, 0.0  ;;  %v456_v24 = vmul.f32 %v2236_v2, %v2780_v28 }
 0x220   :  { %v1214_v41 = vpop.permute.xlu1 %1213  ;;  %v1209_v26 = vpop.permute.xlu0 %1208 }
 0x221   :  { %v1402_v52 = vmul.f32 %v1209_v26, %v954_v46  ;;  %v1403_v33 = vmul.f32 %v1214_v41, %v955_v19  ;;  %v2772_v26 = vld [vmem:[#allocation20_spill] sm:$0xff]  ;;  %v899_v19 = vadd.f32 %v2773_v38, %v451_v32  ;;  %v970_v38 = vmax.f32 %v2316_v35, 0.0 }
 0x222   :  { %v452_v59 = vmul.f32 %v2236_v2, %v2772_v26 }
 0x223   :  { %v1465_v53 = vadd.f32 %v1464_v37, %v1402_v52  ;;  %v961_v37 = vmax.f32 %v897_v21, 0.0  ;;  %v962_v52 = vmax.f32 %v898_v1, 0.0  ;;  %v963_v36 = vmax.f32 %v899_v19, 0.0 }
 0x224   :  { %v900_v58 = vadd.f32 %v2775_v20, %v452_v59  ;;  %v904_v21 = vadd.f32 %v2782_v47, %v456_v24  ;;  %v2786_v24 = vld [vmem:[#allocation62_spill] sm:$0xff] }
 0x225   :  { %v1466_v17 = vadd.f32 %v1465_v53, %v1403_v33  ;;  %v1410_v33 = vmul.f32 %v1249_v42, %v962_v52 }
 0x227   :  { %v1467_v45 = vadd.f32 %v1466_v17, %v1404_v8  ;;  %v1279_v53 = vpop.permute.xlu2 %1278  ;;  %v901_v8 = vadd.f32 %v2776_v22, %v453_v54  ;;  %v973_v22 = vmax.f32 %v2337_v15, 0.0 }
 0x228   :  { %v1229_v61 = vpop.permute.xlu1 %1228  ;;  %v1224_v14 = vpop.permute.xlu0 %1223 }
 0x229   :  { %v1405_v31 = vmul.f32 %v1224_v14, %v957_v62  ;;  %v1406_v56 = vmul.f32 %v1229_v61, %v958_v7  ;;  %v964_v61 = vmax.f32 %v900_v58, 0.0  ;;  %v2779_v7 = vld [vmem:[#allocation51_spill] sm:$0xff]  ;;  %v965_v39 = vmax.f32 %v901_v8, 0.0  ;;  %v2784_v58 = vld [vmem:[#allocation56_spill] sm:$0xff] }
 0x22b   :  { %v1468_v23 = vadd.f32 %v1467_v45, %v1405_v31  ;;  %v454_v45 = vmul.f32 %v2236_v2, %v2777_v60 }
 0x22d   :  { %v1469_v48 = vadd.f32 %v1468_v23, %v1406_v56  ;;  %v902_v31 = vadd.f32 %v2779_v7, %v454_v45  ;;  %v903_v56 = vadd.f32 %v2781_v27, %v455_v51  ;;  %v1413_v23 = vmul.f32 %v1264_v43, %v965_v39 }
 0x22e   :  { %v976_v7 = vmax.f32 %v2356_v10, 0.0  ;;  %v977_v39 = vmax.f32 %v2354_v55, 0.0  ;;  %v978_v27 = vmax.f32 %v2786_v24, 0.0  ;;  %v981_v55 = vmax.f32 %v2312_v4, 0.0 }
 0x22f   :  { %v1470_v34 = vadd.f32 %v1469_v48, %v1407_v16  ;;  %v966_v12 = vmax.f32 %v902_v31, 0.0  ;;  %v1294_v16 = vpop.permute.xlu2 %1293  ;;  %v967_v1 = vmax.f32 %v903_v56, 0.0 }
 0x230   :  { %v1244_v63 = vpop.permute.xlu1 %1243  ;;  %v1239_v46 = vpop.permute.xlu0 %1238 }
 0x231   :  { %v1408_v41 = vmul.f32 %v1239_v46, %v960_v40  ;;  %v1409_v18 = vmul.f32 %v1244_v63, %v961_v37  ;;  %v968_v63 = vmax.f32 %v904_v21, 0.0  ;;  %v980_v21 = vmax.f32 %v2373_v9, 0.0  ;;  %v2788_v9 = vld [vmem:[#allocation65_spill] sm:$0xff] }
 0x233   :  { %v1471_v50 = vadd.f32 %v1470_v34, %v1408_v41  ;;  %v1416_v32 = vmul.f32 %v1279_v53, %v968_v63  ;;  %v2783_v41 = vld [vmem:[#allocation54_spill] sm:$0xff] }
 0x234   :  { %v969_v2 = vmax.f32 %v2783_v41, 0.0 }
 0x235   :  { %v1472_v49 = vadd.f32 %v1471_v50, %v1409_v18  ;;  %v971_v18 = vmax.f32 %v2314_v30, 0.0  ;;  %v2785_v30 = vld [vmem:[#allocation59_spill] sm:$0xff] }
 0x237   :  { %v1473_v17 = vadd.f32 %v1472_v49, %v1410_v33  ;;  %v1309_v19 = vpop.permute.xlu2 %1308  ;;  %v1419_v54 = vmul.f32 %v1294_v16, %v971_v18  ;;  %v972_v33 = vmax.f32 %v2784_v58, 0.0 }
 0x238   :  { %v1259_v62 = vpop.permute.xlu1 %1258  ;;  %v1254_v13 = vpop.permute.xlu0 %1253 }
 0x239   :  { %v1411_v14 = vmul.f32 %v1254_v13, %v963_v36  ;;  %v1412_v42 = vmul.f32 %v1259_v62, %v964_v61  ;;  %v975_v61 = vmax.f32 %v2785_v30, 0.0 }
 0x23b   :  { %v1474_v0 = vadd.f32 %v1473_v17, %v1411_v14  ;;  %v974_v17 = vmax.f32 %v2335_v44, 0.0 }
 0x23d   :  { %v1475_v25 = vadd.f32 %v1474_v0, %v1412_v42  ;;  %v1422_v60 = vmul.f32 %v1309_v19, %v974_v17 }
 0x23f   :  { %v1476_v48 = vadd.f32 %v1475_v25, %v1413_v23  ;;  %v1324_v62 = vpop.permute.xlu2 %1323 }
 0x240   :  { %v1274_v40 = vpop.permute.xlu1 %1273  ;;  %v1269_v57 = vpop.permute.xlu0 %1268  ;;  %v1425_v0 = vmul.f32 %v1324_v62, %v977_v39 }
 0x241   :  { %v1414_v34 = vmul.f32 %v1269_v57, %v966_v12  ;;  %v1415_v46 = vmul.f32 %v1274_v40, %v967_v1  ;;  %v979_v12 = vmax.f32 %v2375_v29, 0.0 }
 0x243   :  { %v1477_v11 = vadd.f32 %v1476_v48, %v1414_v34 }
 0x245   :  { %v1478_v37 = vadd.f32 %v1477_v11, %v1415_v46  ;;  %v982_v46 = vmax.f32 %v2394_v3, 0.0 }
 0x247   :  { %v1479_v26 = vadd.f32 %v1478_v37, %v1416_v32  ;;  %v1339_v28 = vpop.permute.xlu2 %1338  ;;  %v2787_v32 = vld [vmem:[#allocation66_spill] sm:$0xff] }
 0x248   :  { %v1289_v59 = vpop.permute.xlu1 %1288  ;;  %v1284_v43 = vpop.permute.xlu0 %1283  ;;  %v1428_v48 = vmul.f32 %v1339_v28, %v980_v21  ;;  %v983_v37 = vmax.f32 %v2787_v32, 0.0 }
 0x249   :  { %v1417_v52 = vmul.f32 %v1284_v43, %v969_v2  ;;  %v1418_v50 = vmul.f32 %v1289_v59, %v970_v38  ;;  %v984_v59 = vmax.f32 %v2788_v9, 0.0 }
 0x24b   :  { %v1480_v6 = vadd.f32 %v1479_v26, %v1417_v52  ;;  %v2789_v52 = vld [vmem:[#allocation68_spill] sm:$0xff] }
 0x24c   :  { %v985_v4 = vmax.f32 %v2789_v52, 0.0 }
 0x24d   :  { %v1481_v20 = vadd.f32 %v1480_v6, %v1418_v50  ;;  %v2790_v6 = vld [vmem:[#allocation67_spill] sm:$0xff] }
 0x24f   :  { %v1482_v49 = vadd.f32 %v1481_v20, %v1419_v54  ;;  %v1354_v57 = vpop.permute.xlu2 %1353  ;;  %v986_v54 = vmax.f32 %v2790_v6, 0.0 }
 0x250   :  { %v1304_v53 = vpop.permute.xlu1 %1303  ;;  %v1299_v36 = vpop.permute.xlu0 %1298  ;;  %v1431_v2 = vmul.f32 %v1354_v57, %v983_v37 }
 0x251   :  { %v1420_v8 = vmul.f32 %v1299_v36, %v972_v33  ;;  %v1421_v35 = vmul.f32 %v1304_v53, %v973_v22 }
 0x253   :  { %v1483_v13 = vadd.f32 %v1482_v49, %v1420_v8 }
 0x255   :  { %v1484_v45 = vadd.f32 %v1483_v13, %v1421_v35 }
 0x257   :  { %v1485_v14 = vadd.f32 %v1484_v45, %v1422_v60  ;;  %v1369_v50 = vpop.permute.xlu2 %1368 }
 0x258   :  { %v1319_v5 = vpop.permute.xlu1 %1318  ;;  %v1314_v51 = vpop.permute.xlu0 %1313  ;;  %v1434_v58 = vmul.f32 %v1369_v50, %v986_v54 }
 0x259   :  { %v1423_v31 = vmul.f32 %v1314_v51, %v975_v61  ;;  %v1424_v42 = vmul.f32 %v1319_v5, %v976_v7 }
 0x25b   :  { %v1486_v15 = vadd.f32 %v1485_v14, %v1423_v31 }
 0x25d   :  { %v1487_v44 = vadd.f32 %v1486_v15, %v1424_v42 }
 0x25f   :  { %v1488_v56 = vadd.f32 %v1487_v44, %v1425_v0 }
 0x260   :  { %v1334_v23 = vpop.permute.xlu1 %1333  ;;  %v1329_v25 = vpop.permute.xlu0 %1328 }
 0x261   :  { %v1426_v47 = vmul.f32 %v1329_v25, %v978_v27  ;;  %v1427_v16 = vmul.f32 %v1334_v23, %v979_v12 }
 0x263   :  { %v1489_v10 = vadd.f32 %v1488_v56, %v1426_v47 }
 0x265   :  { %v1490_v40 = vadd.f32 %v1489_v10, %v1427_v16 }
 0x267   :  { %v1491_v1 = vadd.f32 %v1490_v40, %v1428_v48 }
 0x268   :  { %v1349_v34 = vpop.permute.xlu1 %1348  ;;  %v1344_v63 = vpop.permute.xlu0 %1343 }
 0x269   :  { %v1429_v11 = vmul.f32 %v1344_v63, %v981_v55  ;;  %v1430_v41 = vmul.f32 %v1349_v34, %v982_v46 }
 0x26b   :  { %v1492_v29 = vadd.f32 %v1491_v1, %v1429_v11 }
 0x26d   :  { %v1493_v26 = vadd.f32 %v1492_v29, %v1430_v41 }
 0x26f   :  { %v1494_v43 = vadd.f32 %v1493_v26, %v1431_v2 }
 0x270   :  { %v1364_v38 = vpop.permute.xlu1 %1363  ;;  %v1359_v19 = vpop.permute.xlu0 %1358 }
 0x271   :  { %v1432_v18 = vmul.f32 %v1359_v19, %v984_v59  ;;  %v1433_v20 = vmul.f32 %v1364_v38, %v985_v4 }
 0x273   :  { %v1495_v3 = vadd.f32 %v1494_v43, %v1432_v18 }
 0x275   :  { %v1496_v33 = vadd.f32 %v1495_v3, %v1433_v20 }
 0x277   :  { %v1497_v49 = vadd.f32 %v1496_v33, %v1434_v58 }
 0x278   :  { %v1508_v17 = vpop.permute.xlu0 %1507 }
 0x279   :  { %v1498_v53 = vrot.slane %v1497_v49, 4  ;;  %v1510_v13 = vperm.slane %v1508_v17, 0 }
 0x27b   :  { %v1499_v36 = vadd.f32 %v1498_v53, %v1497_v49 }
 0x27d   :  { %v1500_v22 = vrot.slane %v1499_v36, 2 }
 0x27f   :  { %v1501_v8 = vadd.f32 %v1500_v22, %v1499_v36 }
 0x281   :  { %v1502_v62 = vrot.slane %v1501_v8, 1 }
 0x283   :  { %v1503_v35 = vadd.f32 %v1502_v62, %v1501_v8 }
 0x285   :  { %v1511_v60 = vadd.f32 %v1510_v13, %v1503_v35 }
 0x287   :  { %v1512_v45 = vmax.f32 %v1511_v60, 0.0 }
 0x289   :  { %1513 = vst [vmem:[#allocation3] sm:$0x1] %v1512_v45 }
 0x28a   :  { %1524 = dma.vmem_to_hbm [thread:$0]  %s1520_s24, 16, %s1522_s26, [#allocation4]  }
 0x28b   :  { %1560 = dma.done.wait [#allocation4], 16  }
 0x28c   :  { %1561 = vsyncadd [#allocation4], 4294967280 }
 0x28d   :  { %1529 = vsyncpa [#allocation4], 1 }

</bundles_post_ra>
